<compile_context>
chip_gen: v5e
topology: v5e:2x2
jax: 0.10.0
libtpu: 0.0.40
codegen_flags: <defaults>
</compile_context>

<pallas_src>
import math
from functools import partial

import jax
import jax.numpy as jnp
from jax.experimental import pallas as pl
from jax.experimental.pallas import tpu as pltpu

# ---- model configuration (small shapes consistent with the module) ----
BATCH      = 8
USER_DIM   = 24
MOVIE_DIM  = 40
DENSE_HID  = 32
FM_LATENT  = 16
D_MODEL    = 32
NHEAD      = 4
HEAD_DIM   = D_MODEL // NHEAD
FFN_DIM    = 64
NUM_LAYERS = 2
LN_EPS     = 1e-5
LANES      = 128          # lane width of the packed parameter buffer


def _layer_norm(x, g, b):
    mu = jnp.mean(x, axis=-1, keepdims=True)
    var = jnp.mean(jnp.square(x - mu), axis=-1, keepdims=True)
    return (x - mu) * jax.lax.rsqrt(var + LN_EPS) * g + b


# ---------------------------------------------------------------------------
# Raw parameters (mirroring the PyTorch layers)
# ---------------------------------------------------------------------------
def init_raw_params(key):
    """Weights stored as (in_features, out_features); biases as 1-D vectors.
    Values are snapped to bf16-representable numbers so the bf16 packed buffer is
    a lossless copy and the f32 reference uses bit-identical parameters."""
    keys = iter(jax.random.split(key, 128))

    def rnd(*shape, scale=0.1):
        w = (scale * jax.random.normal(next(keys), shape)).astype(jnp.float32)
        return w.astype(jnp.bfloat16).astype(jnp.float32)

    raw = dict(
        Wud=rnd(USER_DIM, DENSE_HID),  bud=rnd(DENSE_HID),
        Wmd=rnd(MOVIE_DIM, DENSE_HID), bmd=rnd(DENSE_HID),
        Wug=rnd(USER_DIM, DENSE_HID),  bug=rnd(DENSE_HID),
        Wup=rnd(USER_DIM, DENSE_HID),  bup=rnd(DENSE_HID),
        Wmg=rnd(MOVIE_DIM, DENSE_HID), bmg=rnd(DENSE_HID),
        Wmp=rnd(MOVIE_DIM, DENSE_HID), bmp=rnd(DENSE_HID),
        V=rnd(USER_DIM + MOVIE_DIM, FM_LATENT),
        Wut=rnd(DENSE_HID, D_MODEL), but=rnd(D_MODEL),
        Wmt=rnd(DENSE_HID, D_MODEL), bmt=rnd(D_MODEL),
        wp=rnd(D_MODEL, 1), bp=rnd(1),
        Wfc1=rnd(D_MODEL + FM_LATENT, DENSE_HID), bfc1=rnd(DENSE_HID),
        Wfc2=rnd(DENSE_HID, 1), bfc2=rnd(1),
        layers=[],
    )
    for _ in range(NUM_LAYERS):
        raw['layers'].append(dict(
            Wq=rnd(D_MODEL, D_MODEL), bq=rnd(D_MODEL),
            Wk=rnd(D_MODEL, D_MODEL), bk=rnd(D_MODEL),
            Wv=rnd(D_MODEL, D_MODEL), bv=rnd(D_MODEL),
            Wo=rnd(D_MODEL, D_MODEL), bo=rnd(D_MODEL),
            W1=rnd(D_MODEL, FFN_DIM), b1=rnd(FFN_DIM),
            W2=rnd(FFN_DIM, D_MODEL), b2=rnd(D_MODEL),
            g1=jnp.ones(D_MODEL, jnp.float32), be1=jnp.zeros(D_MODEL, jnp.float32),
            g2=jnp.ones(D_MODEL, jnp.float32), be2=jnp.zeros(D_MODEL, jnp.float32),
        ))
    return raw


# ---------------------------------------------------------------------------
# Dense parameter packing: one (rows, 128) bf16 buffer, lane co-located entries,
# row groups aligned to the bf16 (16, 128) tile.
# ---------------------------------------------------------------------------
class _Packer:
    def __init__(self):
        self.layout = {}          # name -> (row0, nrows, lane0, ncols)  static ints
        self.blocks = []
        self.rows = 0

    def group(self, entries):
        """Place 2-D tensors side-by-side along lanes; all start at the group's row 0."""
        placed, lane, max_r = [], 0, 0
        for name, a in entries:
            a = jnp.asarray(a, jnp.float32)
            if a.ndim == 1:
                a = a[None, :]
            r, c = a.shape
            placed.append((name, a, lane, r, c))
            lane += c
            max_r = max(max_r, r)
        assert lane <= LANES
        nrows_p = ((max_r + 15) // 16) * 16
        block = jnp.zeros((nrows_p, LANES), jnp.float32)
        for name, a, l0, r, c in placed:
            self.layout[name] = (self.rows, r, l0, c)
            block = block.at[:r, l0:l0 + c].set(a)
        self.blocks.append(block)
        self.rows += nrows_p

    def vector_group(self, rows):
        """rows: list of list of (name, 1-D vec).  Each inner list is one buffer row,
        entries lane-concatenated (several small vectors per row)."""
        nrows_p = ((len(rows) + 15) // 16) * 16
        block = jnp.zeros((nrows_p, LANES), jnp.float32)
        for i, row in enumerate(rows):
            lane = 0
            for name, v in row:
                v = jnp.asarray(v, jnp.float32).reshape(-1)
                c = v.shape[0]
                self.layout[name] = (self.rows + i, 1, lane, c)
                block = block.at[i, lane:lane + c].set(v)
                lane += c
            assert lane <= LANES
        self.blocks.append(block)
        self.rows += nrows_p

    def pack(self):
        return jnp.concatenate(self.blocks, axis=0).astype(jnp.bfloat16)


def pack_params(raw):
    pk = _Packer()
    L0, L1 = raw['layers']
    Vu, Vm = raw['V'][:USER_DIM], raw['V'][USER_DIM:]
    z16 = jnp.zeros((FM_LATENT,), jnp.float32)

    # fused branch weights: dense|gate|proj|FM-latent  (one dot per input)
    pk.group([('WU', jnp.concatenate([raw['Wud'], raw['Wug'], raw['Wup'], Vu], axis=1))])
    pk.group([('WM', jnp.concatenate([raw['Wmd'], raw['Wmg'], raw['Wmp'], Vm], axis=1))])
    # 32-row square weights, lane co-located
    pk.group([('Wut', raw['Wut']), ('Wmt', raw['Wmt']), ('Wo0', L0['Wo']), ('Wo1', L1['Wo'])])
    # fused QKV per layer (+ per-head segment matrix with 1/sqrt(head_dim) folded in)
    seg = (jnp.arange(D_MODEL)[:, None] // HEAD_DIM
           == jnp.arange(NHEAD)[None, :]).astype(jnp.float32)
    pk.group([('Wqkv0', jnp.concatenate([L0['Wq'], L0['Wk'], L0['Wv']], axis=1)),
              ('Ssc', seg / math.sqrt(HEAD_DIM))])
    pk.group([('Wqkv1', jnp.concatenate([L1['Wq'], L1['Wk'], L1['Wv']], axis=1))])
    # FFN first linears
    pk.group([('W10', L0['W1']), ('W11', L1['W1'])])
    # FFN second linears + fused FM squared latent + whole fc1 weight
    pk.group([('W20', L0['W2']), ('W21', L1['W2']),
              ('Vsq', raw['V'] ** 2), ('Wfc1', raw['Wfc1'])])
    # 1-row vectors, several per row (biases zero-extended to 112 lanes where the
    # fused branch dot also produces the bias-free FM term)
    pk.vector_group([
        [('b_user',  jnp.concatenate([raw['bud'], raw['bug'], raw['bup'], z16])),
         ('bp', raw['bp']), ('bfc2', raw['bfc2'])],
        [('b_movie', jnp.concatenate([raw['bmd'], raw['bmg'], raw['bmp'], z16]))],
        [('but', raw['but']), ('bmt', raw['bmt']),
         ('wp', raw['wp'].reshape(-1)), ('wfc2', raw['Wfc2'].reshape(-1))],
        [('bqkv0', jnp.concatenate([L0['bq'], L0['bk'], L0['bv']])), ('bo0', L0['bo'])],
        [('bqkv1', jnp.concatenate([L1['bq'], L1['bk'], L1['bv']])), ('bo1', L1['bo'])],
        [('b10', L0['b1']), ('b20', L0['b2']), ('g10', L0['g1'])],
        [('b11', L1['b1']), ('b21', L1['b2']), ('g11', L1['g1'])],
        [('be10', L0['be1']), ('g20', L0['g2']), ('be20', L0['be2']), ('bfc1', raw['bfc1'])],
        [('be11', L1['be1']), ('g21', L1['g2']), ('be21', L1['be2'])],
    ])
    return pk.pack(), pk.layout


# ---------------------------------------------------------------------------
# Pallas kernel: one (parallel) batch-tile per grid point, everything VMEM-resident.
# Weights are bf16; matmuls run bf16 x bf16 -> f32; elementwise math stays f32.
# ---------------------------------------------------------------------------
def recnet_kernel(layout, user_ref, movie_ref, p_ref, out_ref):
    def W(name):                                   # bf16 weight slice for MXU use
        r0, nr, l0, nc = layout[name]
        return p_ref[r0:r0 + nr, :][:, l0:l0 + nc]

    def Wf(name):                                  # f32 copy for VPU / bias use
        return W(name).astype(jnp.float32)

    def dot(a, b):                                 # bf16 inputs, f32 accumulation
        return jnp.dot(a.astype(jnp.bfloat16), b, preferred_element_type=jnp.float32)

    relu = lambda z: jnp.maximum(z, 0.0)
    # logistic with the divide on the EUP slot
    sigmoid = lambda z: pl.reciprocal(1.0 + jnp.exp(-z), approx=True)

    user = user_ref[...]
    movie = movie_ref[...]
    B = user.shape[0]
    H = DENSE_HID

    # --- fused dense / gated branches + FM first moment (one dot per input) ---
    u = dot(user, W('WU')) + Wf('b_user')          # (B, 112): dense | gate | proj | xv_u
    m = dot(movie, W('WM')) + Wf('b_movie')
    user_final = relu(u[:, 0:H]) + sigmoid(u[:, H:2 * H]) * relu(u[:, 2 * H:3 * H])
    movie_final = relu(m[:, 0:H]) + sigmoid(m[:, H:2 * H]) * relu(m[:, 2 * H:3 * H])

    # --- factorization machine (V folded into the branch dots; one fused sq dot) ---
    xv = u[:, 3 * H:3 * H + FM_LATENT] + m[:, 3 * H:3 * H + FM_LATENT]
    x2 = jnp.concatenate([user * user, movie * movie], axis=1)     # (B, 64)
    ss = dot(x2, W('Vsq'))
    fm_out = 0.5 * (xv * xv - ss)

    # --- transformer: 2-token sequence stacked along the batch (sublane) axis ---
    x0 = dot(user_final, W('Wut')) + Wf('but')
    x1 = dot(movie_final, W('Wmt')) + Wf('bmt')
    X = jnp.concatenate([x0, x1], axis=0)                          # (2B, D_MODEL)

    for l in range(NUM_LAYERS):
        qkv = dot(X, W(f'Wqkv{l}')) + Wf(f'bqkv{l}')               # (2B, 96)
        q = qkv[:, 0:D_MODEL]
        k = qkv[:, D_MODEL:2 * D_MODEL]
        v = qkv[:, 2 * D_MODEL:3 * D_MODEL]
        kd = k[0:B] - k[B:2 * B]                                   # k0 - k1
        v1 = v[B:2 * B]
        vd = v[0:B] - v1                                           # v0 - v1
        # 2-key softmax == sigmoid of the per-head score difference; both tokens'
        # scores computed with ONE stacked dot (1/sqrt(head_dim) folded into Ssc).
        kd2 = jnp.concatenate([kd, kd], axis=0)                    # (2B, D_MODEL)
        w = sigmoid(dot(q * kd2, W('Ssc')))                        # (2B, NHEAD)
        # expand per-head weights across head_dim lanes (VPU/XLU broadcast, no MXU)
        w_full = jnp.concatenate(
            [jnp.broadcast_to(w[:, h:h + 1], (2 * B, HEAD_DIM)) for h in range(NHEAD)],
            axis=1)                                                # (2B, D_MODEL)
        A = jnp.concatenate([v1, v1], axis=0) + w_full * jnp.concatenate([vd, vd], axis=0)
        A = dot(A, W(f'Wo{l}')) + Wf(f'bo{l}')
        # post-LN residual blocks (PyTorch norm_first=False; eval -> dropout = id)
        X = _layer_norm(X + A, Wf(f'g1{l}'), Wf(f'be1{l}'))
        F = dot(relu(dot(X, W(f'W1{l}')) + Wf(f'b1{l}')), W(f'W2{l}')) + Wf(f'b2{l}')
        X = _layer_norm(X + F, Wf(f'g2{l}'), Wf(f'be2{l}'))

    # --- attention pooling over the 2 tokens (2-way softmax via sigmoid) ---
    s = jnp.sum(X * Wf('wp'), axis=-1, keepdims=True) + Wf('bp')   # (2B, 1)
    aw0 = sigmoid(s[0:B] - s[B:2 * B])
    attended = X[B:2 * B] + aw0 * (X[0:B] - X[B:2 * B])

    # --- prediction head: one fused (B,48)@(48,32) dot, then a row-wise reduce ---
    comb = jnp.concatenate([attended, fm_out], axis=1)
    h = relu(dot(comb, W('Wfc1')) + Wf('bfc1'))
    # Dropout(0.2) is identity at inference.
    out = jnp.sum(h * Wf('wfc2'), axis=-1, keepdims=True) + Wf('bfc2')
    out_ref[...] = out.astype(out_ref.dtype)


def build_recnet(layout):
    kernel = partial(recnet_kernel, layout)

    @jax.jit
    def run(user, movie, packed):
        batch = user.shape[0]
        tb = batch if batch <= 128 else 128
        assert batch % tb == 0 and (tb == batch or tb % 8 == 0)
        rows = packed.shape[0]
        return pl.pallas_call(
            kernel,
            out_shape=jax.ShapeDtypeStruct((batch, 1), jnp.float32),
            grid=(batch // tb,),
            in_specs=[
                pl.BlockSpec((tb, USER_DIM), lambda i: (i, 0)),
                pl.BlockSpec((tb, MOVIE_DIM), lambda i: (i, 0)),
                pl.BlockSpec((rows, LANES), lambda i: (0, 0)),   # params: resident
            ],
            out_specs=pl.BlockSpec((tb, 1), lambda i: (i, 0)),
            compiler_params=pltpu.CompilerParams(
                dimension_semantics=("parallel",)),   # shards batch tiles on v7x's 2 TCs
        )(user, movie, packed)

    return run


# ---------------------------------------------------------------------------
# Independent pure-JAX reference mirroring the PyTorch module structure
# (explicit concats, per-head softmax attention, post-LN encoder layers).
# ---------------------------------------------------------------------------
def reference_forward(user, movie, raw):
    relu = lambda z: jnp.maximum(z, 0.0)
    sigmoid = jax.nn.sigmoid
    hp = jax.lax.Precision.HIGHEST
    mm = lambda a, b: jnp.matmul(a, b, precision=hp)

    user_emb = relu(mm(user, raw['Wud']) + raw['bud'])
    movie_emb = relu(mm(movie, raw['Wmd']) + raw['bmd'])
    user_gated = sigmoid(mm(user, raw['Wug']) + raw['bug']) * relu(mm(user, raw['Wup']) + raw['bup'])
    movie_gated = sigmoid(mm(movie, raw['Wmg']) + raw['bmg']) * relu(mm(movie, raw['Wmp']) + raw['bmp'])
    user_final = user_emb + user_gated
    movie_final = movie_emb + movie_gated

    fm_in = jnp.concatenate([user, movie], axis=1)
    fm_out = 0.5 * (mm(fm_in, raw['V']) ** 2 - mm(fm_in ** 2, raw['V'] ** 2))

    x = jnp.stack([mm(user_final, raw['Wut']) + raw['but'],
                   mm(movie_final, raw['Wmt']) + raw['bmt']], axis=1)   # (B, 2, D)
    Bsz = x.shape[0]
    for L in raw['layers']:
        q = mm(x, L['Wq']) + L['bq']
        k = mm(x, L['Wk']) + L['bk']
        v = mm(x, L['Wv']) + L['bv']
        qh = q.reshape(Bsz, 2, NHEAD, HEAD_DIM).transpose(0, 2, 1, 3)
        kh = k.reshape(Bsz, 2, NHEAD, HEAD_DIM).transpose(0, 2, 1, 3)
        vh = v.reshape(Bsz, 2, NHEAD, HEAD_DIM).transpose(0, 2, 1, 3)
        scores = jnp.einsum('bhqd,bhkd->bhqk', qh, kh, precision=hp) / math.sqrt(HEAD_DIM)
        attn = jax.nn.softmax(scores, axis=-1)
        a = jnp.einsum('bhqk,bhkd->bhqd', attn, vh, precision=hp)
        a = a.transpose(0, 2, 1, 3).reshape(Bsz, 2, D_MODEL)
        a = mm(a, L['Wo']) + L['bo']
        x = _layer_norm(x + a, L['g1'], L['be1'])
        f = mm(relu(mm(x, L['W1']) + L['b1']), L['W2']) + L['b2']
        x = _layer_norm(x + f, L['g2'], L['be2'])

    attn_scores = mm(x, raw['wp']) + raw['bp']            # (B, 2, 1)
    attn_weights = jax.nn.softmax(attn_scores, axis=1)
    attended = jnp.sum(x * attn_weights, axis=1)          # (B, D)

    combined = jnp.concatenate([attended, fm_out], axis=1)
    h = relu(mm(combined, raw['Wfc1']) + raw['bfc1'])
    return mm(h, raw['Wfc2']) + raw['bfc2']


if __name__ == "__main__":
    key = jax.random.PRNGKey(0)
    ku, km, kp = jax.random.split(key, 3)
    user_profile = jax.random.normal(ku, (BATCH, USER_DIM), jnp.float32)
    movie_profile = jax.random.normal(km, (BATCH, MOVIE_DIM), jnp.float32)

    raw = init_raw_params(kp)
    packed, layout = pack_params(raw)
    recnet = build_recnet(layout)

    rating_pred = jax.block_until_ready(recnet(user_profile, movie_profile, packed))
    # multitask=False: the PyTorch module returns (rating_pred, None); genre head unused.

    ref = reference_forward(user_profile, movie_profile, raw)
    assert rating_pred.shape == (BATCH, 1)
    assert bool(jnp.all(jnp.isfinite(rating_pred)))
    # Weights are bit-identical (bf16-snapped) in kernel and reference, so the only
    # deviation is bf16 activation rounding at matmul inputs + approx EUP reciprocal,
    # accumulated through the 2-layer post-LN stack: expected <= ~5e-3, tolerance 2e-2
    # still catches structural bugs (which produce O(0.1-1) deviations).
    max_err = float(jnp.max(jnp.abs(rating_pred - ref)))
    assert bool(jnp.allclose(rating_pred, ref, rtol=2e-2, atol=2e-2)), max_err

    print("KERNEL_OK")
</pallas_src>

<mosaic_0001>
module attributes {stable_mosaic.version = 11 : i64} {
  func.func @recnet_kernel(%arg0: i32, %arg1: memref<8x24xf32, #tpu.memory_space<vmem>>, %arg2: memref<8x40xf32, #tpu.memory_space<vmem>>, %arg3: memref<288x128xbf16, #tpu.memory_space<vmem>>, %arg4: memref<8x1xf32, #tpu.memory_space<vmem>>) attributes {dimension_semantics = [#tpu.dimension_semantics<parallel>], iteration_bounds = array<i64: 1>, scalar_prefetch = 0 : i64, scratch_operands = 0 : i64, tpu.core_type = #tpu.core_type<tc>, window_params = [{transform_indices = @transform_0, window_bounds = array<i64: 8, 24>}, {transform_indices = @transform_1, window_bounds = array<i64: 8, 40>}, {pipeline_mode = #tpu.pipeline_mode<synchronous>, transform_indices = @transform_2, window_bounds = array<i64: 288, 128>}, {transform_indices = @transform_3, window_bounds = array<i64: 8, 1>}]} {
    %c0 = arith.constant 0 : index
    %c0_0 = arith.constant 0 : index
    %0 = vector.load %arg1[%c0, %c0_0] : memref<8x24xf32, #tpu.memory_space<vmem>>, vector<8x24xf32>
    %c0_1 = arith.constant 0 : index
    %c0_2 = arith.constant 0 : index
    %1 = vector.load %arg2[%c0_1, %c0_2] : memref<8x40xf32, #tpu.memory_space<vmem>>, vector<8x40xf32>
    %c0_3 = arith.constant 0 : index
    %c0_4 = arith.constant 0 : index
    %2 = vector.load %arg3[%c0_3, %c0_4] : memref<288x128xbf16, #tpu.memory_space<vmem>>, vector<24x128xbf16>
    %3 = vector.extract_strided_slice %2 {offsets = [0, 0], sizes = [24, 112], strides = [1, 1]} : vector<24x128xbf16> to vector<24x112xbf16>
    %4 = arith.truncf %0 : vector<8x24xf32> to vector<8x24xbf16>
    %cst = arith.constant dense<0.000000e+00> : vector<8x112xf32>
    %5 = tpu.matmul %4, %3, %cst {dimension_numbers = #tpu.dot_dimension_numbers<[1], [0], [0], [1], [0, 0, 1, 1], [], []>} : vector<8x24xbf16>, vector<24x112xbf16>, vector<8x112xf32> -> vector<8x112xf32>
    %c272 = arith.constant 272 : index
    %c0_5 = arith.constant 0 : index
    %6 = vector.load %arg3[%c272, %c0_5] : memref<288x128xbf16, #tpu.memory_space<vmem>>, vector<1x128xbf16>
    %7 = vector.extract_strided_slice %6 {offsets = [0, 0], sizes = [1, 112], strides = [1, 1]} : vector<1x128xbf16> to vector<1x112xbf16>
    %8 = arith.extf %7 : vector<1x112xbf16> to vector<1x112xf32>
    %9 = vector.broadcast %8 : vector<1x112xf32> to vector<8x112xf32>
    %10 = arith.addf %5, %9 : vector<8x112xf32>
    %c32 = arith.constant 32 : index
    %c0_6 = arith.constant 0 : index
    %11 = vector.load %arg3[%c32, %c0_6] : memref<288x128xbf16, #tpu.memory_space<vmem>>, vector<40x128xbf16>
    %12 = vector.extract_strided_slice %11 {offsets = [0, 0], sizes = [40, 112], strides = [1, 1]} : vector<40x128xbf16> to vector<40x112xbf16>
    %13 = arith.truncf %1 : vector<8x40xf32> to vector<8x40xbf16>
    %cst_7 = arith.constant dense<0.000000e+00> : vector<8x112xf32>
    %14 = tpu.matmul %13, %12, %cst_7 {dimension_numbers = #tpu.dot_dimension_numbers<[1], [0], [0], [1], [0, 0, 1, 1], [], []>} : vector<8x40xbf16>, vector<40x112xbf16>, vector<8x112xf32> -> vector<8x112xf32>
    %c273 = arith.constant 273 : index
    %c0_8 = arith.constant 0 : index
    %15 = vector.load %arg3[%c273, %c0_8] : memref<288x128xbf16, #tpu.memory_space<vmem>>, vector<1x128xbf16>
    %16 = vector.extract_strided_slice %15 {offsets = [0, 0], sizes = [1, 112], strides = [1, 1]} : vector<1x128xbf16> to vector<1x112xbf16>
    %17 = arith.extf %16 : vector<1x112xbf16> to vector<1x112xf32>
    %18 = vector.broadcast %17 : vector<1x112xf32> to vector<8x112xf32>
    %19 = arith.addf %14, %18 : vector<8x112xf32>
    %20 = vector.extract_strided_slice %10 {offsets = [0, 0], sizes = [8, 32], strides = [1, 1]} : vector<8x112xf32> to vector<8x32xf32>
    %cst_9 = arith.constant 0.000000e+00 : f32
    %21 = vector.broadcast %cst_9 : f32 to vector<8x32xf32>
    %22 = arith.maximumf %20, %21 : vector<8x32xf32>
    %23 = vector.extract_strided_slice %10 {offsets = [0, 32], sizes = [8, 32], strides = [1, 1]} : vector<8x112xf32> to vector<8x32xf32>
    %cst_10 = arith.constant 0.000000e+00 : f32
    %24 = vector.broadcast %cst_10 : f32 to vector<8x32xf32>
    %25 = arith.subf %24, %23 : vector<8x32xf32>
    %26 = math.exp %25 : vector<8x32xf32>
    %cst_11 = arith.constant 1.000000e+00 : f32
    %27 = vector.broadcast %cst_11 : f32 to vector<8x32xf32>
    %28 = arith.addf %27, %26 : vector<8x32xf32>
    %29 = tpu.reciprocal %28 {approx = true} : vector<8x32xf32> -> vector<8x32xf32>
    %30 = vector.extract_strided_slice %10 {offsets = [0, 64], sizes = [8, 32], strides = [1, 1]} : vector<8x112xf32> to vector<8x32xf32>
    %cst_12 = arith.constant 0.000000e+00 : f32
    %31 = vector.broadcast %cst_12 : f32 to vector<8x32xf32>
    %32 = arith.maximumf %30, %31 : vector<8x32xf32>
    %33 = arith.mulf %29, %32 : vector<8x32xf32>
    %34 = arith.addf %22, %33 : vector<8x32xf32>
    %35 = vector.extract_strided_slice %19 {offsets = [0, 0], sizes = [8, 32], strides = [1, 1]} : vector<8x112xf32> to vector<8x32xf32>
    %cst_13 = arith.constant 0.000000e+00 : f32
    %36 = vector.broadcast %cst_13 : f32 to vector<8x32xf32>
    %37 = arith.maximumf %35, %36 : vector<8x32xf32>
    %38 = vector.extract_strided_slice %19 {offsets = [0, 32], sizes = [8, 32], strides = [1, 1]} : vector<8x112xf32> to vector<8x32xf32>
    %cst_14 = arith.constant 0.000000e+00 : f32
    %39 = vector.broadcast %cst_14 : f32 to vector<8x32xf32>
    %40 = arith.subf %39, %38 : vector<8x32xf32>
    %41 = math.exp %40 : vector<8x32xf32>
    %cst_15 = arith.constant 1.000000e+00 : f32
    %42 = vector.broadcast %cst_15 : f32 to vector<8x32xf32>
    %43 = arith.addf %42, %41 : vector<8x32xf32>
    %44 = tpu.reciprocal %43 {approx = true} : vector<8x32xf32> -> vector<8x32xf32>
    %45 = vector.extract_strided_slice %19 {offsets = [0, 64], sizes = [8, 32], strides = [1, 1]} : vector<8x112xf32> to vector<8x32xf32>
    %cst_16 = arith.constant 0.000000e+00 : f32
    %46 = vector.broadcast %cst_16 : f32 to vector<8x32xf32>
    %47 = arith.maximumf %45, %46 : vector<8x32xf32>
    %48 = arith.mulf %44, %47 : vector<8x32xf32>
    %49 = arith.addf %37, %48 : vector<8x32xf32>
    %50 = vector.extract_strided_slice %10 {offsets = [0, 96], sizes = [8, 16], strides = [1, 1]} : vector<8x112xf32> to vector<8x16xf32>
    %51 = vector.extract_strided_slice %19 {offsets = [0, 96], sizes = [8, 16], strides = [1, 1]} : vector<8x112xf32> to vector<8x16xf32>
    %52 = arith.addf %50, %51 : vector<8x16xf32>
    %53 = arith.mulf %0, %0 : vector<8x24xf32>
    %54 = arith.mulf %1, %1 : vector<8x40xf32>
    %55 = tpu.concatenate %53, %54 in 1 : vector<8x24xf32>, vector<8x40xf32> -> vector<8x64xf32>
    %c208 = arith.constant 208 : index
    %c0_17 = arith.constant 0 : index
    %56 = vector.load %arg3[%c208, %c0_17] : memref<288x128xbf16, #tpu.memory_space<vmem>>, vector<64x128xbf16>
    %57 = vector.extract_strided_slice %56 {offsets = [0, 64], sizes = [64, 16], strides = [1, 1]} : vector<64x128xbf16> to vector<64x16xbf16>
    %58 = arith.truncf %55 : vector<8x64xf32> to vector<8x64xbf16>
    %cst_18 = arith.constant dense<0.000000e+00> : vector<8x16xf32>
    %59 = tpu.matmul %58, %57, %cst_18 {dimension_numbers = #tpu.dot_dimension_numbers<[1], [0], [0], [1], [0, 0, 1, 1], [], []>} : vector<8x64xbf16>, vector<64x16xbf16>, vector<8x16xf32> -> vector<8x16xf32>
    %60 = arith.mulf %52, %52 : vector<8x16xf32>
    %61 = arith.subf %60, %59 : vector<8x16xf32>
    %cst_19 = arith.constant 5.000000e-01 : f32
    %62 = vector.broadcast %cst_19 : f32 to vector<8x16xf32>
    %63 = arith.mulf %62, %61 : vector<8x16xf32>
    %c80 = arith.constant 80 : index
    %c0_20 = arith.constant 0 : index
    %64 = vector.load %arg3[%c80, %c0_20] : memref<288x128xbf16, #tpu.memory_space<vmem>>, vector<32x128xbf16>
    %65 = vector.extract_strided_slice %64 {offsets = [0, 0], sizes = [32, 32], strides = [1, 1]} : vector<32x128xbf16> to vector<32x32xbf16>
    %66 = arith.truncf %34 : vector<8x32xf32> to vector<8x32xbf16>
    %cst_21 = arith.constant dense<0.000000e+00> : vector<8x32xf32>
    %67 = tpu.matmul %66, %65, %cst_21 {dimension_numbers = #tpu.dot_dimension_numbers<[1], [0], [0], [1], [0, 0, 1, 1], [], []>} : vector<8x32xbf16>, vector<32x32xbf16>, vector<8x32xf32> -> vector<8x32xf32>
    %c274 = arith.constant 274 : index
    %c0_22 = arith.constant 0 : index
    %68 = vector.load %arg3[%c274, %c0_22] : memref<288x128xbf16, #tpu.memory_space<vmem>>, vector<1x128xbf16>
    %69 = vector.extract_strided_slice %68 {offsets = [0, 0], sizes = [1, 32], strides = [1, 1]} : vector<1x128xbf16> to vector<1x32xbf16>
    %70 = arith.extf %69 : vector<1x32xbf16> to vector<1x32xf32>
    %71 = vector.broadcast %70 : vector<1x32xf32> to vector<8x32xf32>
    %72 = arith.addf %67, %71 : vector<8x32xf32>
    %c80_23 = arith.constant 80 : index
    %c0_24 = arith.constant 0 : index
    %73 = vector.load %arg3[%c80_23, %c0_24] : memref<288x128xbf16, #tpu.memory_space<vmem>>, vector<32x128xbf16>
    %74 = vector.extract_strided_slice %73 {offsets = [0, 32], sizes = [32, 32], strides = [1, 1]} : vector<32x128xbf16> to vector<32x32xbf16>
    %75 = arith.truncf %49 : vector<8x32xf32> to vector<8x32xbf16>
    %cst_25 = arith.constant dense<0.000000e+00> : vector<8x32xf32>
    %76 = tpu.matmul %75, %74, %cst_25 {dimension_numbers = #tpu.dot_dimension_numbers<[1], [0], [0], [1], [0, 0, 1, 1], [], []>} : vector<8x32xbf16>, vector<32x32xbf16>, vector<8x32xf32> -> vector<8x32xf32>
    %c274_26 = arith.constant 274 : index
    %c0_27 = arith.constant 0 : index
    %77 = vector.load %arg3[%c274_26, %c0_27] : memref<288x128xbf16, #tpu.memory_space<vmem>>, vector<1x128xbf16>
    %78 = vector.extract_strided_slice %77 {offsets = [0, 32], sizes = [1, 32], strides = [1, 1]} : vector<1x128xbf16> to vector<1x32xbf16>
    %79 = arith.extf %78 : vector<1x32xbf16> to vector<1x32xf32>
    %80 = vector.broadcast %79 : vector<1x32xf32> to vector<8x32xf32>
    %81 = arith.addf %76, %80 : vector<8x32xf32>
    %82 = tpu.concatenate %72, %81 in 0 : vector<8x32xf32>, vector<8x32xf32> -> vector<16x32xf32>
    %c112 = arith.constant 112 : index
    %c0_28 = arith.constant 0 : index
    %83 = vector.load %arg3[%c112, %c0_28] : memref<288x128xbf16, #tpu.memory_space<vmem>>, vector<32x128xbf16>
    %84 = vector.extract_strided_slice %83 {offsets = [0, 0], sizes = [32, 96], strides = [1, 1]} : vector<32x128xbf16> to vector<32x96xbf16>
    %85 = arith.truncf %82 : vector<16x32xf32> to vector<16x32xbf16>
    %cst_29 = arith.constant dense<0.000000e+00> : vector<16x96xf32>
    %86 = tpu.matmul %85, %84, %cst_29 {dimension_numbers = #tpu.dot_dimension_numbers<[1], [0], [0], [1], [0, 0, 1, 1], [], []>} : vector<16x32xbf16>, vector<32x96xbf16>, vector<16x96xf32> -> vector<16x96xf32>
    %c275 = arith.constant 275 : index
    %c0_30 = arith.constant 0 : index
    %87 = vector.load %arg3[%c275, %c0_30] : memref<288x128xbf16, #tpu.memory_space<vmem>>, vector<1x128xbf16>
    %88 = vector.extract_strided_slice %87 {offsets = [0, 0], sizes = [1, 96], strides = [1, 1]} : vector<1x128xbf16> to vector<1x96xbf16>
    %89 = arith.extf %88 : vector<1x96xbf16> to vector<1x96xf32>
    %90 = vector.broadcast %89 : vector<1x96xf32> to vector<16x96xf32>
    %91 = arith.addf %86, %90 : vector<16x96xf32>
    %92 = vector.extract_strided_slice %91 {offsets = [0, 0], sizes = [16, 32], strides = [1, 1]} : vector<16x96xf32> to vector<16x32xf32>
    %93 = vector.extract_strided_slice %91 {offsets = [0, 32], sizes = [16, 32], strides = [1, 1]} : vector<16x96xf32> to vector<16x32xf32>
    %94 = vector.extract_strided_slice %91 {offsets = [0, 64], sizes = [16, 32], strides = [1, 1]} : vector<16x96xf32> to vector<16x32xf32>
    %95 = vector.extract_strided_slice %93 {offsets = [0, 0], sizes = [8, 32], strides = [1, 1]} : vector<16x32xf32> to vector<8x32xf32>
    %96 = vector.extract_strided_slice %93 {offsets = [8, 0], sizes = [8, 32], strides = [1, 1]} : vector<16x32xf32> to vector<8x32xf32>
    %97 = arith.subf %95, %96 : vector<8x32xf32>
    %98 = vector.extract_strided_slice %94 {offsets = [8, 0], sizes = [8, 32], strides = [1, 1]} : vector<16x32xf32> to vector<8x32xf32>
    %99 = vector.extract_strided_slice %94 {offsets = [0, 0], sizes = [8, 32], strides = [1, 1]} : vector<16x32xf32> to vector<8x32xf32>
    %100 = arith.subf %99, %98 : vector<8x32xf32>
    %101 = tpu.concatenate %97, %97 in 0 : vector<8x32xf32>, vector<8x32xf32> -> vector<16x32xf32>
    %102 = arith.mulf %92, %101 : vector<16x32xf32>
    %c112_31 = arith.constant 112 : index
    %c0_32 = arith.constant 0 : index
    %103 = vector.load %arg3[%c112_31, %c0_32] : memref<288x128xbf16, #tpu.memory_space<vmem>>, vector<32x128xbf16>
    %104 = vector.extract_strided_slice %103 {offsets = [0, 96], sizes = [32, 4], strides = [1, 1]} : vector<32x128xbf16> to vector<32x4xbf16>
    %105 = arith.truncf %102 : vector<16x32xf32> to vector<16x32xbf16>
    %cst_33 = arith.constant dense<0.000000e+00> : vector<16x4xf32>
    %106 = tpu.matmul %105, %104, %cst_33 {dimension_numbers = #tpu.dot_dimension_numbers<[1], [0], [0], [1], [0, 0, 1, 1], [], []>} : vector<16x32xbf16>, vector<32x4xbf16>, vector<16x4xf32> -> vector<16x4xf32>
    %cst_34 = arith.constant 0.000000e+00 : f32
    %107 = vector.broadcast %cst_34 : f32 to vector<16x4xf32>
    %108 = arith.subf %107, %106 : vector<16x4xf32>
    %109 = math.exp %108 : vector<16x4xf32>
    %cst_35 = arith.constant 1.000000e+00 : f32
    %110 = vector.broadcast %cst_35 : f32 to vector<16x4xf32>
    %111 = arith.addf %110, %109 : vector<16x4xf32>
    %112 = tpu.reciprocal %111 {approx = true} : vector<16x4xf32> -> vector<16x4xf32>
    %113 = vector.extract_strided_slice %112 {offsets = [0, 0], sizes = [16, 1], strides = [1, 1]} : vector<16x4xf32> to vector<16x1xf32>
    %114 = vector.shape_cast %113 : vector<16x1xf32> to vector<16x1xf32>
    %115 = vector.broadcast %114 : vector<16x1xf32> to vector<16x8xf32>
    %116 = vector.extract_strided_slice %112 {offsets = [0, 1], sizes = [16, 1], strides = [1, 1]} : vector<16x4xf32> to vector<16x1xf32>
    %117 = vector.shape_cast %116 : vector<16x1xf32> to vector<16x1xf32>
    %118 = vector.broadcast %117 : vector<16x1xf32> to vector<16x8xf32>
    %119 = vector.extract_strided_slice %112 {offsets = [0, 2], sizes = [16, 1], strides = [1, 1]} : vector<16x4xf32> to vector<16x1xf32>
    %120 = vector.shape_cast %119 : vector<16x1xf32> to vector<16x1xf32>
    %121 = vector.broadcast %120 : vector<16x1xf32> to vector<16x8xf32>
    %122 = vector.extract_strided_slice %112 {offsets = [0, 3], sizes = [16, 1], strides = [1, 1]} : vector<16x4xf32> to vector<16x1xf32>
    %123 = vector.shape_cast %122 : vector<16x1xf32> to vector<16x1xf32>
    %124 = vector.broadcast %123 : vector<16x1xf32> to vector<16x8xf32>
    %125 = tpu.concatenate %115, %118, %121, %124 in 1 : vector<16x8xf32>, vector<16x8xf32>, vector<16x8xf32>, vector<16x8xf32> -> vector<16x32xf32>
    %126 = tpu.concatenate %98, %98 in 0 : vector<8x32xf32>, vector<8x32xf32> -> vector<16x32xf32>
    %127 = tpu.concatenate %100, %100 in 0 : vector<8x32xf32>, vector<8x32xf32> -> vector<16x32xf32>
    %128 = arith.mulf %125, %127 : vector<16x32xf32>
    %129 = arith.addf %126, %128 : vector<16x32xf32>
    %c80_36 = arith.constant 80 : index
    %c0_37 = arith.constant 0 : index
    %130 = vector.load %arg3[%c80_36, %c0_37] : memref<288x128xbf16, #tpu.memory_space<vmem>>, vector<32x128xbf16>
    %131 = vector.extract_strided_slice %130 {offsets = [0, 64], sizes = [32, 32], strides = [1, 1]} : vector<32x128xbf16> to vector<32x32xbf16>
    %132 = arith.truncf %129 : vector<16x32xf32> to vector<16x32xbf16>
    %cst_38 = arith.constant dense<0.000000e+00> : vector<16x32xf32>
    %133 = tpu.matmul %132, %131, %cst_38 {dimension_numbers = #tpu.dot_dimension_numbers<[1], [0], [0], [1], [0, 0, 1, 1], [], []>} : vector<16x32xbf16>, vector<32x32xbf16>, vector<16x32xf32> -> vector<16x32xf32>
    %c275_39 = arith.constant 275 : index
    %c0_40 = arith.constant 0 : index
    %134 = vector.load %arg3[%c275_39, %c0_40] : memref<288x128xbf16, #tpu.memory_space<vmem>>, vector<1x128xbf16>
    %135 = vector.extract_strided_slice %134 {offsets = [0, 96], sizes = [1, 32], strides = [1, 1]} : vector<1x128xbf16> to vector<1x32xbf16>
    %136 = arith.extf %135 : vector<1x32xbf16> to vector<1x32xf32>
    %137 = vector.broadcast %136 : vector<1x32xf32> to vector<16x32xf32>
    %138 = arith.addf %133, %137 : vector<16x32xf32>
    %139 = arith.addf %82, %138 : vector<16x32xf32>
    %c277 = arith.constant 277 : index
    %c0_41 = arith.constant 0 : index
    %140 = vector.load %arg3[%c277, %c0_41] : memref<288x128xbf16, #tpu.memory_space<vmem>>, vector<1x128xbf16>
    %141 = vector.extract_strided_slice %140 {offsets = [0, 96], sizes = [1, 32], strides = [1, 1]} : vector<1x128xbf16> to vector<1x32xbf16>
    %142 = arith.extf %141 : vector<1x32xbf16> to vector<1x32xf32>
    %c279 = arith.constant 279 : index
    %c0_42 = arith.constant 0 : index
    %143 = vector.load %arg3[%c279, %c0_42] : memref<288x128xbf16, #tpu.memory_space<vmem>>, vector<1x128xbf16>
    %144 = vector.extract_strided_slice %143 {offsets = [0, 0], sizes = [1, 32], strides = [1, 1]} : vector<1x128xbf16> to vector<1x32xbf16>
    %145 = arith.extf %144 : vector<1x32xbf16> to vector<1x32xf32>
    %cst_43 = arith.constant dense<0.000000e+00> : vector<16xf32>
    %146 = vector.multi_reduction <add>, %139, %cst_43 [1] : vector<16x32xf32> to vector<16xf32>
    %147 = vector.shape_cast %146 : vector<16xf32> to vector<16x1xf32>
    %cst_44 = arith.constant 3.200000e+01 : f32
    %148 = vector.broadcast %cst_44 : f32 to vector<16x1xf32>
    %149 = arith.divf %147, %148 : vector<16x1xf32>
    %150 = vector.broadcast %149 : vector<16x1xf32> to vector<16x32xf32>
    %151 = arith.subf %139, %150 : vector<16x32xf32>
    %152 = arith.mulf %151, %151 : vector<16x32xf32>
    %cst_45 = arith.constant dense<0.000000e+00> : vector<16xf32>
    %153 = vector.multi_reduction <add>, %152, %cst_45 [1] : vector<16x32xf32> to vector<16xf32>
    %154 = vector.shape_cast %153 : vector<16xf32> to vector<16x1xf32>
    %cst_46 = arith.constant 3.200000e+01 : f32
    %155 = vector.broadcast %cst_46 : f32 to vector<16x1xf32>
    %156 = arith.divf %154, %155 : vector<16x1xf32>
    %157 = vector.broadcast %149 : vector<16x1xf32> to vector<16x32xf32>
    %158 = arith.subf %139, %157 : vector<16x32xf32>
    %cst_47 = arith.constant 9.99999974E-6 : f32
    %159 = vector.broadcast %cst_47 : f32 to vector<16x1xf32>
    %160 = arith.addf %156, %159 : vector<16x1xf32>
    %161 = math.rsqrt %160 : vector<16x1xf32>
    %162 = vector.broadcast %161 : vector<16x1xf32> to vector<16x32xf32>
    %163 = arith.mulf %158, %162 : vector<16x32xf32>
    %164 = vector.broadcast %142 : vector<1x32xf32> to vector<16x32xf32>
    %165 = arith.mulf %163, %164 : vector<16x32xf32>
    %166 = vector.broadcast %145 : vector<1x32xf32> to vector<16x32xf32>
    %167 = arith.addf %165, %166 : vector<16x32xf32>
    %c176 = arith.constant 176 : index
    %c0_48 = arith.constant 0 : index
    %168 = vector.load %arg3[%c176, %c0_48] : memref<288x128xbf16, #tpu.memory_space<vmem>>, vector<32x128xbf16>
    %169 = vector.extract_strided_slice %168 {offsets = [0, 0], sizes = [32, 64], strides = [1, 1]} : vector<32x128xbf16> to vector<32x64xbf16>
    %170 = arith.truncf %167 : vector<16x32xf32> to vector<16x32xbf16>
    %cst_49 = arith.constant dense<0.000000e+00> : vector<16x64xf32>
    %171 = tpu.matmul %170, %169, %cst_49 {dimension_numbers = #tpu.dot_dimension_numbers<[1], [0], [0], [1], [0, 0, 1, 1], [], []>} : vector<16x32xbf16>, vector<32x64xbf16>, vector<16x64xf32> -> vector<16x64xf32>
    %c277_50 = arith.constant 277 : index
    %c0_51 = arith.constant 0 : index
    %172 = vector.load %arg3[%c277_50, %c0_51] : memref<288x128xbf16, #tpu.memory_space<vmem>>, vector<1x128xbf16>
    %173 = vector.extract_strided_slice %172 {offsets = [0, 0], sizes = [1, 64], strides = [1, 1]} : vector<1x128xbf16> to vector<1x64xbf16>
    %174 = arith.extf %173 : vector<1x64xbf16> to vector<1x64xf32>
    %175 = vector.broadcast %174 : vector<1x64xf32> to vector<16x64xf32>
    %176 = arith.addf %171, %175 : vector<16x64xf32>
    %cst_52 = arith.constant 0.000000e+00 : f32
    %177 = vector.broadcast %cst_52 : f32 to vector<16x64xf32>
    %178 = arith.maximumf %176, %177 : vector<16x64xf32>
    %c208_53 = arith.constant 208 : index
    %c0_54 = arith.constant 0 : index
    %179 = vector.load %arg3[%c208_53, %c0_54] : memref<288x128xbf16, #tpu.memory_space<vmem>>, vector<64x128xbf16>
    %180 = vector.extract_strided_slice %179 {offsets = [0, 0], sizes = [64, 32], strides = [1, 1]} : vector<64x128xbf16> to vector<64x32xbf16>
    %181 = arith.truncf %178 : vector<16x64xf32> to vector<16x64xbf16>
    %cst_55 = arith.constant dense<0.000000e+00> : vector<16x32xf32>
    %182 = tpu.matmul %181, %180, %cst_55 {dimension_numbers = #tpu.dot_dimension_numbers<[1], [0], [0], [1], [0, 0, 1, 1], [], []>} : vector<16x64xbf16>, vector<64x32xbf16>, vector<16x32xf32> -> vector<16x32xf32>
    %c277_56 = arith.constant 277 : index
    %c0_57 = arith.constant 0 : index
    %183 = vector.load %arg3[%c277_56, %c0_57] : memref<288x128xbf16, #tpu.memory_space<vmem>>, vector<1x128xbf16>
    %184 = vector.extract_strided_slice %183 {offsets = [0, 64], sizes = [1, 32], strides = [1, 1]} : vector<1x128xbf16> to vector<1x32xbf16>
    %185 = arith.extf %184 : vector<1x32xbf16> to vector<1x32xf32>
    %186 = vector.broadcast %185 : vector<1x32xf32> to vector<16x32xf32>
    %187 = arith.addf %182, %186 : vector<16x32xf32>
    %188 = arith.addf %167, %187 : vector<16x32xf32>
    %c279_58 = arith.constant 279 : index
    %c0_59 = arith.constant 0 : index
    %189 = vector.load %arg3[%c279_58, %c0_59] : memref<288x128xbf16, #tpu.memory_space<vmem>>, vector<1x128xbf16>
    %190 = vector.extract_strided_slice %189 {offsets = [0, 32], sizes = [1, 32], strides = [1, 1]} : vector<1x128xbf16> to vector<1x32xbf16>
    %191 = arith.extf %190 : vector<1x32xbf16> to vector<1x32xf32>
    %c279_60 = arith.constant 279 : index
    %c0_61 = arith.constant 0 : index
    %192 = vector.load %arg3[%c279_60, %c0_61] : memref<288x128xbf16, #tpu.memory_space<vmem>>, vector<1x128xbf16>
    %193 = vector.extract_strided_slice %192 {offsets = [0, 64], sizes = [1, 32], strides = [1, 1]} : vector<1x128xbf16> to vector<1x32xbf16>
    %194 = arith.extf %193 : vector<1x32xbf16> to vector<1x32xf32>
    %cst_62 = arith.constant dense<0.000000e+00> : vector<16xf32>
    %195 = vector.multi_reduction <add>, %188, %cst_62 [1] : vector<16x32xf32> to vector<16xf32>
    %196 = vector.shape_cast %195 : vector<16xf32> to vector<16x1xf32>
    %cst_63 = arith.constant 3.200000e+01 : f32
    %197 = vector.broadcast %cst_63 : f32 to vector<16x1xf32>
    %198 = arith.divf %196, %197 : vector<16x1xf32>
    %199 = vector.broadcast %198 : vector<16x1xf32> to vector<16x32xf32>
    %200 = arith.subf %188, %199 : vector<16x32xf32>
    %201 = arith.mulf %200, %200 : vector<16x32xf32>
    %cst_64 = arith.constant dense<0.000000e+00> : vector<16xf32>
    %202 = vector.multi_reduction <add>, %201, %cst_64 [1] : vector<16x32xf32> to vector<16xf32>
    %203 = vector.shape_cast %202 : vector<16xf32> to vector<16x1xf32>
    %cst_65 = arith.constant 3.200000e+01 : f32
    %204 = vector.broadcast %cst_65 : f32 to vector<16x1xf32>
    %205 = arith.divf %203, %204 : vector<16x1xf32>
    %206 = vector.broadcast %198 : vector<16x1xf32> to vector<16x32xf32>
    %207 = arith.subf %188, %206 : vector<16x32xf32>
    %cst_66 = arith.constant 9.99999974E-6 : f32
    %208 = vector.broadcast %cst_66 : f32 to vector<16x1xf32>
    %209 = arith.addf %205, %208 : vector<16x1xf32>
    %210 = math.rsqrt %209 : vector<16x1xf32>
    %211 = vector.broadcast %210 : vector<16x1xf32> to vector<16x32xf32>
    %212 = arith.mulf %207, %211 : vector<16x32xf32>
    %213 = vector.broadcast %191 : vector<1x32xf32> to vector<16x32xf32>
    %214 = arith.mulf %212, %213 : vector<16x32xf32>
    %215 = vector.broadcast %194 : vector<1x32xf32> to vector<16x32xf32>
    %216 = arith.addf %214, %215 : vector<16x32xf32>
    %c144 = arith.constant 144 : index
    %c0_67 = arith.constant 0 : index
    %217 = vector.load %arg3[%c144, %c0_67] : memref<288x128xbf16, #tpu.memory_space<vmem>>, vector<32x128xbf16>
    %218 = vector.extract_strided_slice %217 {offsets = [0, 0], sizes = [32, 96], strides = [1, 1]} : vector<32x128xbf16> to vector<32x96xbf16>
    %219 = arith.truncf %216 : vector<16x32xf32> to vector<16x32xbf16>
    %cst_68 = arith.constant dense<0.000000e+00> : vector<16x96xf32>
    %220 = tpu.matmul %219, %218, %cst_68 {dimension_numbers = #tpu.dot_dimension_numbers<[1], [0], [0], [1], [0, 0, 1, 1], [], []>} : vector<16x32xbf16>, vector<32x96xbf16>, vector<16x96xf32> -> vector<16x96xf32>
    %c276 = arith.constant 276 : index
    %c0_69 = arith.constant 0 : index
    %221 = vector.load %arg3[%c276, %c0_69] : memref<288x128xbf16, #tpu.memory_space<vmem>>, vector<1x128xbf16>
    %222 = vector.extract_strided_slice %221 {offsets = [0, 0], sizes = [1, 96], strides = [1, 1]} : vector<1x128xbf16> to vector<1x96xbf16>
    %223 = arith.extf %222 : vector<1x96xbf16> to vector<1x96xf32>
    %224 = vector.broadcast %223 : vector<1x96xf32> to vector<16x96xf32>
    %225 = arith.addf %220, %224 : vector<16x96xf32>
    %226 = vector.extract_strided_slice %225 {offsets = [0, 0], sizes = [16, 32], strides = [1, 1]} : vector<16x96xf32> to vector<16x32xf32>
    %227 = vector.extract_strided_slice %225 {offsets = [0, 32], sizes = [16, 32], strides = [1, 1]} : vector<16x96xf32> to vector<16x32xf32>
    %228 = vector.extract_strided_slice %225 {offsets = [0, 64], sizes = [16, 32], strides = [1, 1]} : vector<16x96xf32> to vector<16x32xf32>
    %229 = vector.extract_strided_slice %227 {offsets = [0, 0], sizes = [8, 32], strides = [1, 1]} : vector<16x32xf32> to vector<8x32xf32>
    %230 = vector.extract_strided_slice %227 {offsets = [8, 0], sizes = [8, 32], strides = [1, 1]} : vector<16x32xf32> to vector<8x32xf32>
    %231 = arith.subf %229, %230 : vector<8x32xf32>
    %232 = vector.extract_strided_slice %228 {offsets = [8, 0], sizes = [8, 32], strides = [1, 1]} : vector<16x32xf32> to vector<8x32xf32>
    %233 = vector.extract_strided_slice %228 {offsets = [0, 0], sizes = [8, 32], strides = [1, 1]} : vector<16x32xf32> to vector<8x32xf32>
    %234 = arith.subf %233, %232 : vector<8x32xf32>
    %235 = tpu.concatenate %231, %231 in 0 : vector<8x32xf32>, vector<8x32xf32> -> vector<16x32xf32>
    %236 = arith.mulf %226, %235 : vector<16x32xf32>
    %c112_70 = arith.constant 112 : index
    %c0_71 = arith.constant 0 : index
    %237 = vector.load %arg3[%c112_70, %c0_71] : memref<288x128xbf16, #tpu.memory_space<vmem>>, vector<32x128xbf16>
    %238 = vector.extract_strided_slice %237 {offsets = [0, 96], sizes = [32, 4], strides = [1, 1]} : vector<32x128xbf16> to vector<32x4xbf16>
    %239 = arith.truncf %236 : vector<16x32xf32> to vector<16x32xbf16>
    %cst_72 = arith.constant dense<0.000000e+00> : vector<16x4xf32>
    %240 = tpu.matmul %239, %238, %cst_72 {dimension_numbers = #tpu.dot_dimension_numbers<[1], [0], [0], [1], [0, 0, 1, 1], [], []>} : vector<16x32xbf16>, vector<32x4xbf16>, vector<16x4xf32> -> vector<16x4xf32>
    %cst_73 = arith.constant 0.000000e+00 : f32
    %241 = vector.broadcast %cst_73 : f32 to vector<16x4xf32>
    %242 = arith.subf %241, %240 : vector<16x4xf32>
    %243 = math.exp %242 : vector<16x4xf32>
    %cst_74 = arith.constant 1.000000e+00 : f32
    %244 = vector.broadcast %cst_74 : f32 to vector<16x4xf32>
    %245 = arith.addf %244, %243 : vector<16x4xf32>
    %246 = tpu.reciprocal %245 {approx = true} : vector<16x4xf32> -> vector<16x4xf32>
    %247 = vector.extract_strided_slice %246 {offsets = [0, 0], sizes = [16, 1], strides = [1, 1]} : vector<16x4xf32> to vector<16x1xf32>
    %248 = vector.shape_cast %247 : vector<16x1xf32> to vector<16x1xf32>
    %249 = vector.broadcast %248 : vector<16x1xf32> to vector<16x8xf32>
    %250 = vector.extract_strided_slice %246 {offsets = [0, 1], sizes = [16, 1], strides = [1, 1]} : vector<16x4xf32> to vector<16x1xf32>
    %251 = vector.shape_cast %250 : vector<16x1xf32> to vector<16x1xf32>
    %252 = vector.broadcast %251 : vector<16x1xf32> to vector<16x8xf32>
    %253 = vector.extract_strided_slice %246 {offsets = [0, 2], sizes = [16, 1], strides = [1, 1]} : vector<16x4xf32> to vector<16x1xf32>
    %254 = vector.shape_cast %253 : vector<16x1xf32> to vector<16x1xf32>
    %255 = vector.broadcast %254 : vector<16x1xf32> to vector<16x8xf32>
    %256 = vector.extract_strided_slice %246 {offsets = [0, 3], sizes = [16, 1], strides = [1, 1]} : vector<16x4xf32> to vector<16x1xf32>
    %257 = vector.shape_cast %256 : vector<16x1xf32> to vector<16x1xf32>
    %258 = vector.broadcast %257 : vector<16x1xf32> to vector<16x8xf32>
    %259 = tpu.concatenate %249, %252, %255, %258 in 1 : vector<16x8xf32>, vector<16x8xf32>, vector<16x8xf32>, vector<16x8xf32> -> vector<16x32xf32>
    %260 = tpu.concatenate %232, %232 in 0 : vector<8x32xf32>, vector<8x32xf32> -> vector<16x32xf32>
    %261 = tpu.concatenate %234, %234 in 0 : vector<8x32xf32>, vector<8x32xf32> -> vector<16x32xf32>
    %262 = arith.mulf %259, %261 : vector<16x32xf32>
    %263 = arith.addf %260, %262 : vector<16x32xf32>
    %c80_75 = arith.constant 80 : index
    %c0_76 = arith.constant 0 : index
    %264 = vector.load %arg3[%c80_75, %c0_76] : memref<288x128xbf16, #tpu.memory_space<vmem>>, vector<32x128xbf16>
    %265 = vector.extract_strided_slice %264 {offsets = [0, 96], sizes = [32, 32], strides = [1, 1]} : vector<32x128xbf16> to vector<32x32xbf16>
    %266 = arith.truncf %263 : vector<16x32xf32> to vector<16x32xbf16>
    %cst_77 = arith.constant dense<0.000000e+00> : vector<16x32xf32>
    %267 = tpu.matmul %266, %265, %cst_77 {dimension_numbers = #tpu.dot_dimension_numbers<[1], [0], [0], [1], [0, 0, 1, 1], [], []>} : vector<16x32xbf16>, vector<32x32xbf16>, vector<16x32xf32> -> vector<16x32xf32>
    %c276_78 = arith.constant 276 : index
    %c0_79 = arith.constant 0 : index
    %268 = vector.load %arg3[%c276_78, %c0_79] : memref<288x128xbf16, #tpu.memory_space<vmem>>, vector<1x128xbf16>
    %269 = vector.extract_strided_slice %268 {offsets = [0, 96], sizes = [1, 32], strides = [1, 1]} : vector<1x128xbf16> to vector<1x32xbf16>
    %270 = arith.extf %269 : vector<1x32xbf16> to vector<1x32xf32>
    %271 = vector.broadcast %270 : vector<1x32xf32> to vector<16x32xf32>
    %272 = arith.addf %267, %271 : vector<16x32xf32>
    %273 = arith.addf %216, %272 : vector<16x32xf32>
    %c278 = arith.constant 278 : index
    %c0_80 = arith.constant 0 : index
    %274 = vector.load %arg3[%c278, %c0_80] : memref<288x128xbf16, #tpu.memory_space<vmem>>, vector<1x128xbf16>
    %275 = vector.extract_strided_slice %274 {offsets = [0, 96], sizes = [1, 32], strides = [1, 1]} : vector<1x128xbf16> to vector<1x32xbf16>
    %276 = arith.extf %275 : vector<1x32xbf16> to vector<1x32xf32>
    %c280 = arith.constant 280 : index
    %c0_81 = arith.constant 0 : index
    %277 = vector.load %arg3[%c280, %c0_81] : memref<288x128xbf16, #tpu.memory_space<vmem>>, vector<1x128xbf16>
    %278 = vector.extract_strided_slice %277 {offsets = [0, 0], sizes = [1, 32], strides = [1, 1]} : vector<1x128xbf16> to vector<1x32xbf16>
    %279 = arith.extf %278 : vector<1x32xbf16> to vector<1x32xf32>
    %cst_82 = arith.constant dense<0.000000e+00> : vector<16xf32>
    %280 = vector.multi_reduction <add>, %273, %cst_82 [1] : vector<16x32xf32> to vector<16xf32>
    %281 = vector.shape_cast %280 : vector<16xf32> to vector<16x1xf32>
    %cst_83 = arith.constant 3.200000e+01 : f32
    %282 = vector.broadcast %cst_83 : f32 to vector<16x1xf32>
    %283 = arith.divf %281, %282 : vector<16x1xf32>
    %284 = vector.broadcast %283 : vector<16x1xf32> to vector<16x32xf32>
    %285 = arith.subf %273, %284 : vector<16x32xf32>
    %286 = arith.mulf %285, %285 : vector<16x32xf32>
    %cst_84 = arith.constant dense<0.000000e+00> : vector<16xf32>
    %287 = vector.multi_reduction <add>, %286, %cst_84 [1] : vector<16x32xf32> to vector<16xf32>
    %288 = vector.shape_cast %287 : vector<16xf32> to vector<16x1xf32>
    %cst_85 = arith.constant 3.200000e+01 : f32
    %289 = vector.broadcast %cst_85 : f32 to vector<16x1xf32>
    %290 = arith.divf %288, %289 : vector<16x1xf32>
    %291 = vector.broadcast %283 : vector<16x1xf32> to vector<16x32xf32>
    %292 = arith.subf %273, %291 : vector<16x32xf32>
    %cst_86 = arith.constant 9.99999974E-6 : f32
    %293 = vector.broadcast %cst_86 : f32 to vector<16x1xf32>
    %294 = arith.addf %290, %293 : vector<16x1xf32>
    %295 = math.rsqrt %294 : vector<16x1xf32>
    %296 = vector.broadcast %295 : vector<16x1xf32> to vector<16x32xf32>
    %297 = arith.mulf %292, %296 : vector<16x32xf32>
    %298 = vector.broadcast %276 : vector<1x32xf32> to vector<16x32xf32>
    %299 = arith.mulf %297, %298 : vector<16x32xf32>
    %300 = vector.broadcast %279 : vector<1x32xf32> to vector<16x32xf32>
    %301 = arith.addf %299, %300 : vector<16x32xf32>
    %c176_87 = arith.constant 176 : index
    %c0_88 = arith.constant 0 : index
    %302 = vector.load %arg3[%c176_87, %c0_88] : memref<288x128xbf16, #tpu.memory_space<vmem>>, vector<32x128xbf16>
    %303 = vector.extract_strided_slice %302 {offsets = [0, 64], sizes = [32, 64], strides = [1, 1]} : vector<32x128xbf16> to vector<32x64xbf16>
    %304 = arith.truncf %301 : vector<16x32xf32> to vector<16x32xbf16>
    %cst_89 = arith.constant dense<0.000000e+00> : vector<16x64xf32>
    %305 = tpu.matmul %304, %303, %cst_89 {dimension_numbers = #tpu.dot_dimension_numbers<[1], [0], [0], [1], [0, 0, 1, 1], [], []>} : vector<16x32xbf16>, vector<32x64xbf16>, vector<16x64xf32> -> vector<16x64xf32>
    %c278_90 = arith.constant 278 : index
    %c0_91 = arith.constant 0 : index
    %306 = vector.load %arg3[%c278_90, %c0_91] : memref<288x128xbf16, #tpu.memory_space<vmem>>, vector<1x128xbf16>
    %307 = vector.extract_strided_slice %306 {offsets = [0, 0], sizes = [1, 64], strides = [1, 1]} : vector<1x128xbf16> to vector<1x64xbf16>
    %308 = arith.extf %307 : vector<1x64xbf16> to vector<1x64xf32>
    %309 = vector.broadcast %308 : vector<1x64xf32> to vector<16x64xf32>
    %310 = arith.addf %305, %309 : vector<16x64xf32>
    %cst_92 = arith.constant 0.000000e+00 : f32
    %311 = vector.broadcast %cst_92 : f32 to vector<16x64xf32>
    %312 = arith.maximumf %310, %311 : vector<16x64xf32>
    %c208_93 = arith.constant 208 : index
    %c0_94 = arith.constant 0 : index
    %313 = vector.load %arg3[%c208_93, %c0_94] : memref<288x128xbf16, #tpu.memory_space<vmem>>, vector<64x128xbf16>
    %314 = vector.extract_strided_slice %313 {offsets = [0, 32], sizes = [64, 32], strides = [1, 1]} : vector<64x128xbf16> to vector<64x32xbf16>
    %315 = arith.truncf %312 : vector<16x64xf32> to vector<16x64xbf16>
    %cst_95 = arith.constant dense<0.000000e+00> : vector<16x32xf32>
    %316 = tpu.matmul %315, %314, %cst_95 {dimension_numbers = #tpu.dot_dimension_numbers<[1], [0], [0], [1], [0, 0, 1, 1], [], []>} : vector<16x64xbf16>, vector<64x32xbf16>, vector<16x32xf32> -> vector<16x32xf32>
    %c278_96 = arith.constant 278 : index
    %c0_97 = arith.constant 0 : index
    %317 = vector.load %arg3[%c278_96, %c0_97] : memref<288x128xbf16, #tpu.memory_space<vmem>>, vector<1x128xbf16>
    %318 = vector.extract_strided_slice %317 {offsets = [0, 64], sizes = [1, 32], strides = [1, 1]} : vector<1x128xbf16> to vector<1x32xbf16>
    %319 = arith.extf %318 : vector<1x32xbf16> to vector<1x32xf32>
    %320 = vector.broadcast %319 : vector<1x32xf32> to vector<16x32xf32>
    %321 = arith.addf %316, %320 : vector<16x32xf32>
    %322 = arith.addf %301, %321 : vector<16x32xf32>
    %c280_98 = arith.constant 280 : index
    %c0_99 = arith.constant 0 : index
    %323 = vector.load %arg3[%c280_98, %c0_99] : memref<288x128xbf16, #tpu.memory_space<vmem>>, vector<1x128xbf16>
    %324 = vector.extract_strided_slice %323 {offsets = [0, 32], sizes = [1, 32], strides = [1, 1]} : vector<1x128xbf16> to vector<1x32xbf16>
    %325 = arith.extf %324 : vector<1x32xbf16> to vector<1x32xf32>
    %c280_100 = arith.constant 280 : index
    %c0_101 = arith.constant 0 : index
    %326 = vector.load %arg3[%c280_100, %c0_101] : memref<288x128xbf16, #tpu.memory_space<vmem>>, vector<1x128xbf16>
    %327 = vector.extract_strided_slice %326 {offsets = [0, 64], sizes = [1, 32], strides = [1, 1]} : vector<1x128xbf16> to vector<1x32xbf16>
    %328 = arith.extf %327 : vector<1x32xbf16> to vector<1x32xf32>
    %cst_102 = arith.constant dense<0.000000e+00> : vector<16xf32>
    %329 = vector.multi_reduction <add>, %322, %cst_102 [1] : vector<16x32xf32> to vector<16xf32>
    %330 = vector.shape_cast %329 : vector<16xf32> to vector<16x1xf32>
    %cst_103 = arith.constant 3.200000e+01 : f32
    %331 = vector.broadcast %cst_103 : f32 to vector<16x1xf32>
    %332 = arith.divf %330, %331 : vector<16x1xf32>
    %333 = vector.broadcast %332 : vector<16x1xf32> to vector<16x32xf32>
    %334 = arith.subf %322, %333 : vector<16x32xf32>
    %335 = arith.mulf %334, %334 : vector<16x32xf32>
    %cst_104 = arith.constant dense<0.000000e+00> : vector<16xf32>
    %336 = vector.multi_reduction <add>, %335, %cst_104 [1] : vector<16x32xf32> to vector<16xf32>
    %337 = vector.shape_cast %336 : vector<16xf32> to vector<16x1xf32>
    %cst_105 = arith.constant 3.200000e+01 : f32
    %338 = vector.broadcast %cst_105 : f32 to vector<16x1xf32>
    %339 = arith.divf %337, %338 : vector<16x1xf32>
    %340 = vector.broadcast %332 : vector<16x1xf32> to vector<16x32xf32>
    %341 = arith.subf %322, %340 : vector<16x32xf32>
    %cst_106 = arith.constant 9.99999974E-6 : f32
    %342 = vector.broadcast %cst_106 : f32 to vector<16x1xf32>
    %343 = arith.addf %339, %342 : vector<16x1xf32>
    %344 = math.rsqrt %343 : vector<16x1xf32>
    %345 = vector.broadcast %344 : vector<16x1xf32> to vector<16x32xf32>
    %346 = arith.mulf %341, %345 : vector<16x32xf32>
    %347 = vector.broadcast %325 : vector<1x32xf32> to vector<16x32xf32>
    %348 = arith.mulf %346, %347 : vector<16x32xf32>
    %349 = vector.broadcast %328 : vector<1x32xf32> to vector<16x32xf32>
    %350 = arith.addf %348, %349 : vector<16x32xf32>
    %c274_107 = arith.constant 274 : index
    %c0_108 = arith.constant 0 : index
    %351 = vector.load %arg3[%c274_107, %c0_108] : memref<288x128xbf16, #tpu.memory_space<vmem>>, vector<1x128xbf16>
    %352 = vector.extract_strided_slice %351 {offsets = [0, 64], sizes = [1, 32], strides = [1, 1]} : vector<1x128xbf16> to vector<1x32xbf16>
    %353 = arith.extf %352 : vector<1x32xbf16> to vector<1x32xf32>
    %354 = vector.broadcast %353 : vector<1x32xf32> to vector<16x32xf32>
    %355 = arith.mulf %350, %354 : vector<16x32xf32>
    %cst_109 = arith.constant dense<0.000000e+00> : vector<16xf32>
    %356 = vector.multi_reduction <add>, %355, %cst_109 [1] : vector<16x32xf32> to vector<16xf32>
    %357 = vector.shape_cast %356 : vector<16xf32> to vector<16x1xf32>
    %c272_110 = arith.constant 272 : index
    %c0_111 = arith.constant 0 : index
    %358 = vector.load %arg3[%c272_110, %c0_111] : memref<288x128xbf16, #tpu.memory_space<vmem>>, vector<1x128xbf16>
    %359 = vector.extract_strided_slice %358 {offsets = [0, 112], sizes = [1, 1], strides = [1, 1]} : vector<1x128xbf16> to vector<1x1xbf16>
    %360 = arith.extf %359 : vector<1x1xbf16> to vector<1x1xf32>
    %361 = vector.broadcast %360 : vector<1x1xf32> to vector<16x1xf32>
    %362 = arith.addf %357, %361 : vector<16x1xf32>
    %363 = vector.extract_strided_slice %362 {offsets = [0, 0], sizes = [8, 1], strides = [1, 1]} : vector<16x1xf32> to vector<8x1xf32>
    %364 = vector.extract_strided_slice %362 {offsets = [8, 0], sizes = [8, 1], strides = [1, 1]} : vector<16x1xf32> to vector<8x1xf32>
    %365 = arith.subf %363, %364 : vector<8x1xf32>
    %cst_112 = arith.constant 0.000000e+00 : f32
    %366 = vector.broadcast %cst_112 : f32 to vector<8x1xf32>
    %367 = arith.subf %366, %365 : vector<8x1xf32>
    %368 = math.exp %367 : vector<8x1xf32>
    %cst_113 = arith.constant 1.000000e+00 : f32
    %369 = vector.broadcast %cst_113 : f32 to vector<8x1xf32>
    %370 = arith.addf %369, %368 : vector<8x1xf32>
    %371 = tpu.reciprocal %370 {approx = true} : vector<8x1xf32> -> vector<8x1xf32>
    %372 = vector.extract_strided_slice %350 {offsets = [8, 0], sizes = [8, 32], strides = [1, 1]} : vector<16x32xf32> to vector<8x32xf32>
    %373 = vector.extract_strided_slice %350 {offsets = [0, 0], sizes = [8, 32], strides = [1, 1]} : vector<16x32xf32> to vector<8x32xf32>
    %374 = vector.extract_strided_slice %350 {offsets = [8, 0], sizes = [8, 32], strides = [1, 1]} : vector<16x32xf32> to vector<8x32xf32>
    %375 = arith.subf %373, %374 : vector<8x32xf32>
    %376 = vector.broadcast %371 : vector<8x1xf32> to vector<8x32xf32>
    %377 = arith.mulf %376, %375 : vector<8x32xf32>
    %378 = arith.addf %372, %377 : vector<8x32xf32>
    %379 = tpu.concatenate %378, %63 in 1 : vector<8x32xf32>, vector<8x16xf32> -> vector<8x48xf32>
    %c208_114 = arith.constant 208 : index
    %c0_115 = arith.constant 0 : index
    %380 = vector.load %arg3[%c208_114, %c0_115] : memref<288x128xbf16, #tpu.memory_space<vmem>>, vector<48x128xbf16>
    %381 = vector.extract_strided_slice %380 {offsets = [0, 80], sizes = [48, 32], strides = [1, 1]} : vector<48x128xbf16> to vector<48x32xbf16>
    %382 = arith.truncf %379 : vector<8x48xf32> to vector<8x48xbf16>
    %cst_116 = arith.constant dense<0.000000e+00> : vector<8x32xf32>
    %383 = tpu.matmul %382, %381, %cst_116 {dimension_numbers = #tpu.dot_dimension_numbers<[1], [0], [0], [1], [0, 0, 1, 1], [], []>} : vector<8x48xbf16>, vector<48x32xbf16>, vector<8x32xf32> -> vector<8x32xf32>
    %c279_117 = arith.constant 279 : index
    %c0_118 = arith.constant 0 : index
    %384 = vector.load %arg3[%c279_117, %c0_118] : memref<288x128xbf16, #tpu.memory_space<vmem>>, vector<1x128xbf16>
    %385 = vector.extract_strided_slice %384 {offsets = [0, 96], sizes = [1, 32], strides = [1, 1]} : vector<1x128xbf16> to vector<1x32xbf16>
    %386 = arith.extf %385 : vector<1x32xbf16> to vector<1x32xf32>
    %387 = vector.broadcast %386 : vector<1x32xf32> to vector<8x32xf32>
    %388 = arith.addf %383, %387 : vector<8x32xf32>
    %cst_119 = arith.constant 0.000000e+00 : f32
    %389 = vector.broadcast %cst_119 : f32 to vector<8x32xf32>
    %390 = arith.maximumf %388, %389 : vector<8x32xf32>
    %c274_120 = arith.constant 274 : index
    %c0_121 = arith.constant 0 : index
    %391 = vector.load %arg3[%c274_120, %c0_121] : memref<288x128xbf16, #tpu.memory_space<vmem>>, vector<1x128xbf16>
    %392 = vector.extract_strided_slice %391 {offsets = [0, 96], sizes = [1, 32], strides = [1, 1]} : vector<1x128xbf16> to vector<1x32xbf16>
    %393 = arith.extf %392 : vector<1x32xbf16> to vector<1x32xf32>
    %394 = vector.broadcast %393 : vector<1x32xf32> to vector<8x32xf32>
    %395 = arith.mulf %390, %394 : vector<8x32xf32>
    %cst_122 = arith.constant dense<0.000000e+00> : vector<8xf32>
    %396 = vector.multi_reduction <add>, %395, %cst_122 [1] : vector<8x32xf32> to vector<8xf32>
    %397 = vector.shape_cast %396 : vector<8xf32> to vector<8x1xf32>
    %c272_123 = arith.constant 272 : index
    %c0_124 = arith.constant 0 : index
    %398 = vector.load %arg3[%c272_123, %c0_124] : memref<288x128xbf16, #tpu.memory_space<vmem>>, vector<1x128xbf16>
    %399 = vector.extract_strided_slice %398 {offsets = [0, 113], sizes = [1, 1], strides = [1, 1]} : vector<1x128xbf16> to vector<1x1xbf16>
    %400 = arith.extf %399 : vector<1x1xbf16> to vector<1x1xf32>
    %401 = vector.broadcast %400 : vector<1x1xf32> to vector<8x1xf32>
    %402 = arith.addf %397, %401 : vector<8x1xf32>
    %c0_125 = arith.constant 0 : index
    %c0_126 = arith.constant 0 : index
    %403 = vector.load %arg4[%c0_125, %c0_126] : memref<8x1xf32, #tpu.memory_space<vmem>>, vector<8x1xf32>
    tpu.vector_store %arg4[%c0_125, %c0_126], %402 {strides = array<i32>} : memref<8x1xf32, #tpu.memory_space<vmem>>, vector<8x1xf32>,
    return
  }
  func.func @transform_0(%arg0: i32) -> (i32, i32) {
    %c0_i32 = arith.constant 0 : i32
    %c0_i32_0 = arith.constant 0 : i32
    return %arg0, %c0_i32 : i32, i32
  }
  func.func @transform_1(%arg0: i32) -> (i32, i32) {
    %c0_i32 = arith.constant 0 : i32
    %c0_i32_0 = arith.constant 0 : i32
    return %arg0, %c0_i32 : i32, i32
  }
  func.func @transform_2(%arg0: i32) -> (i32, i32) {
    %c0_i32 = arith.constant 0 : i32
    %c0_i32_0 = arith.constant 0 : i32
    %c0_i32_1 = arith.constant 0 : i32
    return %c0_i32, %c0_i32_0 : i32, i32
  }
  func.func @transform_3(%arg0: i32) -> (i32, i32) {
    %c0_i32 = arith.constant 0 : i32
    %c0_i32_0 = arith.constant 0 : i32
    return %arg0, %c0_i32 : i32, i32
  }
}

</mosaic_0001>

<bundles_post_ra>
// kernel: run.1
= control target key start
LH: loop header
LB: loop body
LE: loop exit
PB: predicated region body
PF: predicated region fallthrough
CT: control target
= control target key end

     0   :  { %8 = vsyncpa [#allocation3], 0  ;;  %s1664_s0 = inlined_call_operand.hbm [shape: f32[8,24], index: 0, kind: input, shape index: {}]   ;;  %s1665_s1 = inlined_call_operand.hbm [shape: f32[8,40], index: 1, kind: input, shape index: {}]   ;;  %s1666_s2 = inlined_call_operand.hbm [shape: bf16[288,128], index: 2, kind: input, shape index: {}]   ;;  %s1667_s3 = inlined_call_operand.vmem [shape: f32[8,1], index: 3, kind: output, shape index: {}]  }
   0x1   :  { %9 = vsyncpa [#allocation5], 0  ;;  %s26_s14 = sshll.u32 %s1665_s1, 4  ;;  %s1357_s15 = smov [#allocation4]   ;;  %s27_s14 = int_to_ptr.hbm [resolvable:$true] %s26_s14 }
   0x2   :  { %s28_s16 = sshll.u32 %s1357_s15, 4  ;;  %s15_s19 = sshll.u32 %s1664_s0, 4  ;;  %s29_s16 = int_to_ptr.vmem [resolvable:$true] %s28_s16  ;;  %s16_s19 = int_to_ptr.hbm [resolvable:$true] %s15_s19 }
   0x3   :  { %31 = dma.hbm_to_vmem [thread:$0]  %s27_s14, 128, %s29_s16, [#allocation5]  }
   0x4   :  { %s1358_s20 = smov [#allocation2]   ;;  %s36_s24 = sshll.u32 %s1666_s2, 4  ;;  %s37_s24 = int_to_ptr.hbm [resolvable:$true] %s36_s24 }
   0x5   :  { %s17_s21 = sshll.u32 %s1358_s20, 4  ;;  %s1359_s1 = smov [#allocation6]   ;;  %s18_s21 = int_to_ptr.vmem [resolvable:$true] %s17_s21 }
   0x6   :  { %20 = dma.hbm_to_vmem [thread:$0]  %s16_s19, 128, %s18_s21, [#allocation3]  }
   0x7   :  { %s38_s25 = sshll.u32 %s1359_s1, 4  ;;  %s1360_s26 = smov 64   ;;  %s39_s25 = int_to_ptr.vmem [resolvable:$true] %s38_s25 }
   0x8   :  { %s1361_s27 = smov 4  }
   0x9   :  { %44 = dma.hbm_to_vmem [thread:$0]  %s37_s24, 2304, %s39_s25, [#allocation5], %s1360_s26, %s1360_s26, %s1361_s27  }
   0xa   :  { %1353 = dma.done.wait [#allocation3], 128  }
   0xb   :  { %1354 = vsyncadd [#allocation3], 4294967168 }
   0xc   :  { %1355 = dma.done.wait [#allocation5], 2432  }
   0xd   :  { %1356 = vsyncadd [#allocation5], 4294964864  ;;  %v62_v0 = vld [vmem:[#allocation6 + $0x8] sm:$0xf]  ;;  %v101_v1 = vld [vmem:[#allocation6 + $0x20] sm:$0xf] }
   0xe   :  { %v72_v2 = vunpack.c.l.b16 %v62_v0  ;;  %v113_v3 = vunpack.c.l.b16 %v101_v1  ;;  %vm80_vm0 = vcmask 1043456   ;;  %v1179_v8 = vld [vmem:[#allocation6] sm:$0xff]  ;;  %v1181_v9 = vld [vmem:[#allocation6 + $0x18] sm:$0xff]  ;;  %v1404_v10 = vld [vmem:[#allocation2] sm:$0xff]  ;;  %vm76_vm1 = vcmask 195584   ;;  %s1362_s0 = smov 96  }
   0xf   :  { %v63_v11 = vpack.c.bf16 %v1404_v10, %v1404_v10  ;;  %v1180_v12 = vld [vmem:[#allocation6 + $0x10] sm:$0xff]  ;;  %v1408_v13 = vld [vmem:[#allocation4] sm:$0xff]  ;;  %vm119_vm2 = vcmask 326656   ;;  %v64_v15 = vld [vmem:[#allocation6 + $0x88] sm:$0x1]  ;;  %vm264_vm3 = vcmask 261120  }
  0x10   :  { %v74_v4 = vpack.c.b16 %v72_v2, %v72_v2  ;;  %v116_v5 = vpack.c.b16 %v113_v3, %v113_v3  ;;  %v102_v14 = vpack.c.bf16 %v1408_v13, %v1408_v13  ;;  %v65_v16 = vunpack.c.l.bf16 %v64_v15  ;;  %v1420_v30 = vld [vmem:[#allocation6 + $0x30] sm:$0xff]  ;;  %v1423_v32 = vld [vmem:[#allocation6 + $0x28] sm:$0xff]  ;;  %v1189_v55 = vld [vmem:[#allocation6 + $0x40] sm:$0xff]  ;;  %s1363_s2 = smov 32   ;;  %s1368_s28 = smov 24  }
  0x11   :  { %274 = vmatpush.bf16.msra.mxu3 %v1420_v30  ;;  %v249_v44 = vld [vmem:[#allocation6 + $0x88] sm:$0x2]  ;;  %v1188_v56 = vld [vmem:[#allocation6 + $0x38] sm:$0xff]  ;;  %v1364_v15 = vmov 2   ;;  %vm418_vm4 = vcmask 64512   ;;  %vm421_vm5 = vcmask 130048  }
  0x12   :  { %v82_v6 = vsel %vm80_vm0, %v74_v4, 0  ;;  %v124_v7 = vsel %vm80_vm0, %v116_v5, 0  ;;  %v1413_v17 = vperm.slane %v65_v16, 0  ;;  %v103_v20 = vperm.slane %v65_v16, 1  ;;  %1215 = vset.pattern.permute.xlu2 %v1364_v15  ;;  %s1370_s29 = smov 48   ;;  %s1372_s30 = smov 15  }
  0x13   :  { %90 = vmatpush.bf16.msra.mxu0 %v82_v6  ;;  %131 = vmatpush.bf16.msra.mxu1 %v124_v7  ;;  %v250_v45 = vunpack.c.l.bf16 %v249_v44  ;;  %v1365_v16 = vmov 1   ;;  %vm220_vm6 = vcmask 523264  }
  0x14   :  { %1214 = vset.pattern.permute.xlu0 %v1365_v16 }
  0x15   :  { %275 = vmatpush.bf16.msra.mxu3 %v1423_v32  ;;  %v1432_v46 = vperm.slane %v250_v45, 2  ;;  %v1451_v3 = vperm.slane %v250_v45, 3  ;;  %v1486_v45 = vld [vmem:[#allocation6 + $0x70] sm:$0xff] }
  0x17   :  { %91 = vmatpush.bf16.msra.mxu0 %v1179_v8  ;;  %132 = vmatpush.bf16.msra.mxu1 %v1181_v9 }
  0x19   :  { %335 = vmatpush.bf16.msrb.mxu3 %v1189_v55 }
  0x1a   :  { %1095 = vmatmul.msk.bf16.vlgmr.msra.gmra.mxu0 %vm76_vm1, %v63_v11 }
  0x1b   :  { %133 = vmatpush.bf16.msra.mxu1 %v1180_v12 }
  0x1d   :  { %336 = vmatpush.bf16.msrb.mxu3 %v1188_v56 }
  0x1e   :  { %1104 = vmatmul.msk.bf16.vlgmr.msra.gmra.mxu1 %vm119_vm2, %v102_v14 }
  0x97   :  { %v93_v18 = vpop.f32.mrf.mxu0 }
  0x98   :  { %v94_v19 = vadd.f32 %v93_v18, %v1413_v17  ;;  %v1366_v18 = vmov 0  }
  0x99   :  { %1213 = vset.pattern.permute.xlu1 %v1366_v18 }
  0x9a   :  { %v139_v21 = vmax.f32 %v94_v19, 0.0  ;;  %v140_v28 = vsub.f32 0.0, %v94_v19 }
  0x9b   :  { %v135_v22 = vpop.f32.mrf.mxu1 }
  0x9c   :  { %v136_v23 = vadd.f32 %v135_v22, %v103_v20  ;;  %146 = vrot.lane.b32.xlu0 %v139_v21, %s1362_s0  ;;  %v141_v29 = vmul.f32 1.442695, %v140_v28 }
  0x9e   :  { %v1417_v24 = vadd.f32 %v136_v23, %v94_v19  ;;  %v155_v26 = vmax.f32 %v136_v23, 0.0  ;;  %1235 = vpow2.f32 %v141_v29  ;;  %v156_v31 = vsub.f32 0.0, %v136_v23 }
  0x9f   :  { %v95_v25 = vpop.f32.mrf.mxu0 }
  0xa0   :  { %v157_v33 = vmul.f32 1.442695, %v156_v31 }
  0xa2   :  { %1237 = vpow2.f32 %v157_v33 }
  0xa3   :  { %v137_v27 = vpop.f32.mrf.mxu1 }
  0xa4   :  { %162 = vrot.lane.b32.xlu0 %v155_v26, %s1362_s0  ;;  %v1236_v34 = vpop.eup %1235 }
  0xa5   :  { %v143_v35 = vadd.f32 1.0, %v1236_v34  ;;  %v1367_v34 = vmov 3  }
  0xa7   :  { %1239 = vrcp.f32 %v143_v35  ;;  %v1473_v35 = vld [vmem:[#allocation6 + $0x78] sm:$0xff] }
  0xa8   :  { %v1238_v36 = vpop.eup %1237 }
  0xa9   :  { %v159_v37 = vadd.f32 1.0, %v1238_v36 }
  0xab   :  { %1241 = vrcp.f32 %v159_v37 }
  0xac   :  { %289 = vrot.lane.b32.xlu0 %v1432_v46, %s1362_s0 }
  0xad   :  { %v1240_v38 = vpop.eup %1239 }
  0xb1   :  { %v1242_v41 = vpop.eup %1241 }
  0xb4   :  { %351 = vrot.lane.b32.xlu0 %v1188_v56, %s1363_s2 }
 0x10e   :  { %v147_v39 = vpop.permute.xlu0 %146 }
 0x10f   :  { %v149_v40 = vmul.f32 %v1240_v38, %v147_v39  ;;  %v1477_v38 = vld [vmem:[#allocation6 + $0x68] sm:$0xff] }
 0x111   :  { %151 = vrot.lane.b32.xlu1 %v149_v40, %s1362_s0  ;;  %v1481_v40 = vld [vmem:[#allocation6 + $0x80] sm:$0xff] }
 0x116   :  { %v163_v42 = vpop.permute.xlu0 %162 }
 0x117   :  { %v165_v43 = vmul.f32 %v1242_v41, %v163_v42 }
 0x119   :  { %284 = vrot.lane.b32.xlu1 %v1420_v30, %s1362_s0  ;;  %167 = vrot.lane.b32.xlu2 %v165_v43, %s1362_s0 }
 0x11e   :  { %v290_v58 = vpop.permute.xlu0 %289 }
 0x121   :  { %282 = vrot.lane.b32.xlu2 %v1423_v32, %s1362_s0  ;;  %353 = vrot.lane.b32.xlu1 %v1189_v55, %s1363_s2 }
 0x126   :  { %v1459_v8 = vpop.permute.xlu0 %351 }
 0x173   :  { %v168_v49 = vpop.permute.xlu2 %167 }
 0x174   :  { %v170_v52 = vadd.f32 %v168_v49, %v155_v26 }
 0x176   :  { %v281_v54 = vpack.c.bf16 %v170_v52, %v170_v52 }
 0x17b   :  { %v283_v53 = vpop.permute.xlu2 %282 }
 0x183   :  { %v152_v47 = vpop.permute.xlu1 %151 }
 0x184   :  { %v154_v48 = vadd.f32 %v152_v47, %v139_v21 }
 0x186   :  { %v248_v50 = vpack.c.bf16 %v154_v48, %v154_v48 }
 0x188   :  { %1130 = vmatmul.msk.bf16.vlgmr.msra.gmra.mxu3 %vm264_vm3, %v248_v50 }
 0x189   :  { %590 = vmatpush.bf16.msra.mxu3 %v1481_v40 }
 0x18b   :  { %v285_v51 = vpop.permute.xlu1 %284 }
 0x18c   :  { %301 = vmatpush.bf16.msrb.mxu0 %v285_v51 }
 0x18d   :  { %591 = vmatpush.bf16.msra.mxu3 %v1473_v35 }
 0x190   :  { %302 = vmatpush.bf16.msrb.mxu0 %v283_v53 }
 0x191   :  { %592 = vmatpush.bf16.msra.mxu3 %v1486_v45 }
 0x193   :  { %1131 = vmatmul.msk.bf16.vlgmr.msrb.gmra.mxu0 %vm264_vm3, %v281_v54  ;;  %v1448_v1 = vpop.permute.xlu1 %353 }
 0x194   :  { %366 = vmatpush.bf16.msrb.mxu1 %v1448_v1 }
 0x195   :  { %593 = vmatpush.bf16.msra.mxu3 %v1477_v38 }
 0x198   :  { %367 = vmatpush.bf16.msrb.mxu1 %v1459_v8 }
 0x20b   :  { %v277_v57 = vpop.f32.mrf.mxu3 }
 0x20c   :  { %v1441_v60 = vadd.f32 %v277_v57, %v1432_v46  ;;  %v173_v57 = vmul.f32 %v1408_v13, %v1408_v13 }
 0x210   :  { %v304_v59 = vpop.f32.mrf.mxu0 }
 0x211   :  { %v1443_v61 = vadd.f32 %v304_v59, %v290_v58 }
 0x213   :  { %v312_v62 = vpack.c.bf16 %v1443_v61, %v1441_v60  ;;  %v279_v63 = vpop.f32.mrf.mxu3 }
 0x215   :  { %1140 = vmatmul.msk.bf16.vlgmr.msrb.gmra.mxu3 %vm264_vm3, %v312_v62 }
 0x218   :  { %v306_v0 = vpop.f32.mrf.mxu0 }
 0x298   :  { %v338_v2 = vpop.f32.mrf.mxu3 }
 0x299   :  { %v339_v5 = vadd.f32 %v338_v2, %v1451_v3 }
 0x2a0   :  { %v340_v4 = vpop.f32.mrf.mxu3 }
 0x2a1   :  { %v1455_v6 = vadd.f32 %v340_v4, %v1451_v3  ;;  %v172_v4 = vmul.f32 %v1404_v10, %v1404_v10 }
 0x2a3   :  { %v343_v7 = vsub.f32 %v339_v5, %v1455_v6 }
 0x2a5   :  { %345 = vrot.lane.b32.xlu2 %v343_v7, %s1362_s0 }
 0x2ff   :  { %v346_v9 = vpop.permute.xlu2 %345 }
 0x300   :  { %v348_v11 = vmul.f32 %v346_v9, %v339_v5  ;;  %v349_v12 = vmul.f32 %v346_v9, %v1455_v6 }
 0x302   :  { %v350_v14 = vpack.c.bf16 %v349_v12, %v348_v11 }
 0x304   :  { %1141 = vmatmul.msk.bf16.vlgmr.msrb.gmra.mxu1 %vm264_vm3, %v350_v14 }
 0x381   :  { %v369_v19 = vpop.f32.mrf.mxu1 }
 0x382   :  { %v374_v20 = vsub.f32 0.0, %v369_v19 }
 0x384   :  { %v376_v21 = vmul.f32 1.442695, %v374_v20 }
 0x386   :  { %1243 = vpow2.f32 %v376_v21 }
 0x389   :  { %v371_v22 = vpop.f32.mrf.mxu1 }
 0x38a   :  { %v375_v23 = vsub.f32 0.0, %v371_v22 }
 0x38c   :  { %v1244_v25 = vpop.eup %1243  ;;  %v378_v26 = vmul.f32 1.442695, %v375_v23 }
 0x38d   :  { %v380_v27 = vadd.f32 1.0, %v1244_v25 }
 0x38e   :  { %1245 = vpow2.f32 %v378_v26 }
 0x38f   :  { %1247 = vrcp.f32 %v380_v27  ;;  %v1369_v27 = vmov 32.0  }
 0x394   :  { %v1246_v28 = vpop.eup %1245 }
 0x395   :  { %v1248_v29 = vpop.eup %1247  ;;  %v381_v31 = vadd.f32 1.0, %v1246_v28 }
 0x396   :  { %403 = vperm.xlu2 %1215, %v1248_v29   ;;  %395 = vperm.xlu0 %1214, %v1248_v29  }
 0x397   :  { %1249 = vrcp.f32 %v381_v31  ;;  %386 = vperm.xlu1 %1213, %v1248_v29   ;;  %v1525_v31 = vld [vmem:[#allocation6 + $0x88] sm:$0x4] }
 0x398   :  { %1251 = vrcp.f32 %v1369_v27 }
 0x39d   :  { %v1250_v33 = vpop.eup %1249 }
 0x39e   :  { %1216 = vset.pattern.permute.xlu2 %v1366_v18  ;;  %1220 = vset.pattern.permute.xlu0 %v1367_v34  ;;  %v1252_v28 = vpop.eup %1251 }
 0x39f   :  { %1218 = vset.pattern.permute.xlu1 %v1365_v16  ;;  %415 = vperm.xlu0 %1220, %v1250_v33   ;;  %vm489_vm7 = vweird.f32 %v1252_v28 }
 0x3a0   :  { %399 = vperm.xlu1 %1218, %v1250_v33   ;;  %391 = vperm.xlu2 %1216, %v1250_v33  }
 0x3a7   :  { %1225 = vset.pattern.permute.xlu0 %v1364_v15 }
 0x3a8   :  { %1219 = vset.pattern.permute.xlu1 %v1364_v15  ;;  %1217 = vset.pattern.permute.xlu2 %v1367_v34 }
 0x3a9   :  { %407 = vperm.xlu1 %1219, %v1250_v33   ;;  %411 = vperm.xlu2 %1217, %v1248_v29   ;;  %v485_v29 = vmul.f32 32.0, %v1252_v28  ;;  %v475_v33 = vunpack.c.l.bf16 %v1525_v31 }
 0x3aa   :  { %212 = vrot.lane.b32.xlu0 %v1473_v35, %s1360_s26 }
 0x3b1   :  { %426 = vrot.lane.b32.xlu1 %v343_v7, %s1360_s26  ;;  %1221 = vset.pattern.permute.xlu2 %v1366_v18 }
 0x3b2   :  { %1222 = vset.pattern.permute.xlu1 %v1365_v16  ;;  %208 = vrot.lane.b32.xlu0 %v1477_v38, %s1360_s26 }
 0x3f0   :  { %v404_v37 = vpop.permute.xlu2 %403 }
 0x3fa   :  { %v392_v41 = vpop.permute.xlu2 %391 }
 0x403   :  { %v412_v50 = vpop.permute.xlu2 %411 }
 0x408   :  { %v396_v42 = vpop.permute.xlu0 %395 }
 0x409   :  { %v387_v36 = vpop.permute.xlu1 %386 }
 0x40a   :  { %v419_v44 = vsel %vm418_vm4, %v387_v36, %v396_v42  ;;  %v486_v36 = vsub.f32 1.0, %v485_v29 }
 0x40b   :  { %v422_v48 = vsel %vm421_vm5, %v419_v44, %v404_v37 }
 0x40c   :  { %v424_v54 = vsel %vm76_vm1, %v422_v48, %v412_v50 }
 0x411   :  { %v416_v51 = vpop.permute.xlu0 %415 }
 0x412   :  { %v400_v39 = vpop.permute.xlu1 %399 }
 0x413   :  { %v420_v47 = vsel %vm418_vm4, %v392_v41, %v400_v39 }
 0x41b   :  { %v408_v43 = vpop.permute.xlu1 %407 }
 0x41c   :  { %v423_v49 = vsel %vm421_vm5, %v420_v47, %v408_v43  ;;  %v213_v62 = vpop.permute.xlu0 %212 }
 0x41d   :  { %v425_v53 = vsel %vm76_vm1, %v423_v49, %v416_v51 }
 0x423   :  { %v427_v52 = vpop.permute.xlu1 %426 }
 0x424   :  { %v430_v55 = vmul.f32 %v427_v52, %v425_v53  ;;  %v429_v56 = vmul.f32 %v427_v52, %v424_v54  ;;  %v209_v9 = vpop.permute.xlu0 %208  ;;  %v1542_v53 = vld [vmem:[#allocation6 + $0x88] sm:$0x8] }
 0x425   :  { %v477_v54 = vunpack.c.l.bf16 %v1542_v53 }
 0x426   :  { %435 = vrot.lane.b32.xlu1 %v430_v55, %s1360_s26  ;;  %433 = vrot.lane.b32.xlu2 %v429_v56, %s1360_s26  ;;  %v1551_v56 = vld [vmem:[#allocation6 + $0x60] sm:$0xff] }
 0x427   :  { %v1547_v55 = vperm.slane %v477_v54, 7  ;;  %565 = vmatpush.bf16.msra.mxu0 %v1551_v56 }
 0x42e   :  { %210 = vrot.lane.b32.xlu1 %v1486_v45, %s1360_s26  ;;  %214 = vrot.lane.b32.xlu2 %v1481_v40, %s1360_s26 }
 0x436   :  { %447 = vrot.lane.b32.xlu1 %v1420_v30, %s1360_s26  ;;  %175 = vrot.lane.b32.xlu2 %v173_v57, %s1368_s28 }
 0x43e   :  { %445 = vrot.lane.b32.xlu2 %v1423_v32, %s1360_s26  ;;  %452 = vrot.lane.b32.xlu1 %v1451_v3, %s1363_s2 }
 0x480   :  { %v434_v58 = vpop.permute.xlu2 %433 }
 0x481   :  { %v439_v0 = vadd.f32 %v434_v58, %v1455_v6 }
 0x488   :  { %v215_v59 = vpop.permute.xlu2 %214 }
 0x489   :  { %228 = vmatpush.bf16.msra.mxu2 %v215_v59  ;;  %v1555_v59 = vld [vmem:[#allocation6 + $0x58] sm:$0xff] }
 0x48a   :  { %566 = vmatpush.bf16.msra.mxu0 %v1555_v59 }
 0x48d   :  { %229 = vmatpush.bf16.msra.mxu2 %v213_v62 }
 0x490   :  { %v176_v7 = vpop.permute.xlu2 %175 }
 0x491   :  { %v178_v3 = vsel %vm76_vm1, %v172_v4, %v176_v7 }
 0x492   :  { %v187_v11 = vpack.c.bf16 %v178_v3, %v178_v3 }
 0x498   :  { %v436_v63 = vpop.permute.xlu1 %435 }
 0x499   :  { %v440_v13 = vadd.f32 %v436_v63, %v1455_v6  ;;  %v446_v6 = vpop.permute.xlu2 %445 }
 0x49b   :  { %v441_v2 = vpack.c.bf16 %v440_v13, %v439_v0 }
 0x49d   :  { %443 = vrot.lane.b32.xlu0 %v441_v2, %s1360_s26 }
 0x4a0   :  { %v211_v5 = vpop.permute.xlu1 %210 }
 0x4a1   :  { %230 = vmatpush.bf16.msra.mxu2 %v211_v5 }
 0x4a5   :  { %231 = vmatpush.bf16.msra.mxu2 %v209_v9 }
 0x4a8   :  { %v448_v12 = vpop.permute.xlu1 %447  ;;  %1121 = vmatmul.msk.bf16.vlgmr.msra.gmra.mxu2 %vm220_vm6, %v187_v11 }
 0x4a9   :  { %464 = vmatpush.bf16.msrb.mxu2 %v448_v12 }
 0x4ad   :  { %465 = vmatpush.bf16.msrb.mxu2 %v446_v6 }
 0x4b0   :  { %v453_v19 = vpop.permute.xlu1 %452 }
 0x4b1   :  { %709 = vmatpush.bf16.msra.mxu2 %v1448_v1 }
 0x4b5   :  { %710 = vmatpush.bf16.msra.mxu2 %v1459_v8 }
 0x50f   :  { %v444_v10 = vpop.permute.xlu0 %443 }
 0x510   :  { %1142 = vmatmul.msk.bf16.vlgmr.msrb.gmra.mxu2 %vm264_vm3, %v444_v10 }
 0x52b   :  { %v1519_v14 = vpop.f32.mrf.mxu2 }
 0x533   :  { %v235_v18 = vpop.f32.mrf.mxu2 }
 0x593   :  { %v467_v20 = vpop.f32.mrf.mxu2 }
 0x594   :  { %v468_v21 = vadd.f32 %v467_v20, %v453_v19 }
 0x596   :  { %v472_v22 = vadd.f32 %v468_v21, %v1441_v60  ;;  %v1530_v60 = vperm.slane %v475_v33, 5 }
 0x598   :  { %v478_v23 = vsel %vm264_vm3, %v472_v22, 0.0 }
 0x599   :  { %479 = vadd.xlane.f32.xlu2 %v478_v23 }
 0x59b   :  { %v469_v25 = vpop.f32.mrf.mxu2 }
 0x59c   :  { %v470_v26 = vadd.f32 %v469_v25, %v453_v19 }
 0x59e   :  { %v473_v1 = vadd.f32 %v470_v26, %v1443_v61  ;;  %v487_v61 = vmul.f32 %v1252_v28, %v486_v36 }
 0x5a0   :  { %v481_v8 = vsel %vm264_vm3, %v473_v1, 0.0  ;;  %v488_v37 = vadd.f32 %v1252_v28, %v487_v61 }
 0x5a1   :  { %482 = vadd.xlane.f32.xlu0 %v481_v8 }
 0x5a2   :  { %v1534_v39 = vsel %vm489_vm7, %v1252_v28, %v488_v37 }
 0x5b5   :  { %580 = vrot.lane.b32.xlu0 %v1530_v60, %s1360_s26 }
 0x60c   :  { %v480_v41 = vpop.xlane.xlu2 %479 }
 0x60d   :  { %v491_v42 = vmul.f32 %v1534_v39, %v480_v41 }
 0x60f   :  { %v493_v43 = vsub.f32 %v472_v22, %v491_v42 }
 0x611   :  { %v495_v44 = vmul.f32 %v493_v43, %v493_v43 }
 0x613   :  { %v497_v47 = vsel %vm264_vm3, %v495_v44, 0.0 }
 0x614   :  { %v483_v48 = vpop.xlane.xlu0 %482  ;;  %498 = vadd.xlane.f32.xlu1 %v497_v47 }
 0x615   :  { %v492_v49 = vmul.f32 %v1534_v39, %v483_v48 }
 0x617   :  { %v494_v50 = vsub.f32 %v473_v1, %v492_v49 }
 0x619   :  { %v496_v51 = vmul.f32 %v494_v50, %v494_v50 }
 0x61b   :  { %v500_v52 = vsel %vm264_vm3, %v496_v51, 0.0 }
 0x61c   :  { %501 = vadd.xlane.f32.xlu2 %v500_v52 }
 0x627   :  { %v581_v44 = vpop.permute.xlu0 %580 }
 0x634   :  { %531 = vrot.lane.b32.xlu2 %v1530_v60, %s1363_s2 }
 0x63c   :  { %647 = vrot.lane.b32.xlu2 %v1547_v55, %s1362_s0 }
 0x687   :  { %v499_v57 = vpop.xlane.xlu1 %498 }
 0x688   :  { %v503_v58 = vmul.f32 %v499_v57, %v1534_v39 }
 0x68a   :  { %v505_v62 = vadd.f32 1e-05, %v503_v58 }
 0x68c   :  { %1253 = vrsqrt.f32 %v505_v62  ;;  %vm513_vm9 = vweird.f32 %v505_v62 }
 0x68f   :  { %v502_v63 = vpop.xlane.xlu2 %501 }
 0x690   :  { %v504_v0 = vmul.f32 %v502_v63, %v1534_v39 }
 0x692   :  { %v1254_v13 = vpop.eup %1253  ;;  %v506_v2 = vadd.f32 1e-05, %v504_v0 }
 0x693   :  { %v508_v4 = vmul.f32 %v1254_v13, %v505_v62  ;;  %vm514_vm8 = vweird.f32 %v1254_v13 }
 0x694   :  { %1255 = vrsqrt.f32 %v506_v2  ;;  %vm515_vm10 = vmor %vm513_vm9, %vm514_vm8  ;;  %vm523_vm12 = vweird.f32 %v506_v2 }
 0x695   :  { %v509_v5 = vmul.f32 %v1254_v13, %v508_v4 }
 0x697   :  { %v510_v7 = vmul.f32 0.5, %v509_v5  ;;  %v532_v22 = vpop.permute.xlu2 %531 }
 0x699   :  { %v511_v3 = vsub.f32 1.5, %v510_v7 }
 0x69a   :  { %v1256_v9 = vpop.eup %1255 }
 0x69b   :  { %v518_v11 = vmul.f32 %v1256_v9, %v506_v2  ;;  %v512_v12 = vmul.f32 %v1254_v13, %v511_v3  ;;  %vm524_vm11 = vweird.f32 %v1256_v9 }
 0x69c   :  { %vm525_vm13 = vmor %vm523_vm12, %vm524_vm11 }
 0x69d   :  { %v519_v6 = vmul.f32 %v1256_v9, %v518_v11  ;;  %v516_v18 = vsel %vm515_vm10, %v1254_v13, %v512_v12 }
 0x69e   :  { %v527_v20 = vmul.f32 %v516_v18, %v493_v43 }
 0x69f   :  { %v520_v10 = vmul.f32 0.5, %v519_v6  ;;  %v1192_v6 = vld [vmem:[#allocation6 + $0x48] sm:$0xff] }
 0x6a0   :  { %v534_v26 = vmul.f32 %v532_v22, %v527_v20 }
 0x6a1   :  { %v521_v19 = vsub.f32 1.5, %v520_v10 }
 0x6a2   :  { %v537_v8 = vadd.f32 %v1547_v55, %v534_v26 }
 0x6a3   :  { %v522_v21 = vmul.f32 %v1256_v9, %v521_v19 }
 0x6a5   :  { %v526_v23 = vsel %vm525_vm13, %v1256_v9, %v522_v21  ;;  %v1193_v9 = vld [vmem:[#allocation6 + $0x50] sm:$0xff] }
 0x6a6   :  { %v528_v25 = vmul.f32 %v526_v23, %v494_v50  ;;  %684 = vmatpush.bf16.msra.mxu1 %v1193_v9 }
 0x6a8   :  { %v535_v1 = vmul.f32 %v532_v22, %v528_v25 }
 0x6aa   :  { %v538_v27 = vadd.f32 %v1547_v55, %v535_v1  ;;  %685 = vmatpush.bf16.msra.mxu1 %v1192_v6 }
 0x6ac   :  { %v543_v28 = vpack.c.bf16 %v538_v27, %v537_v8 }
 0x6ae   :  { %1151 = vmatmul.msk.bf16.vlgmr.msra.gmra.mxu0 %vm264_vm3, %v543_v28 }
 0x72b   :  { %v568_v29 = vpop.f32.mrf.mxu0 }
 0x72c   :  { %v569_v36 = vadd.f32 %v568_v29, %v1530_v60 }
 0x72e   :  { %v573_v41 = vmax.f32 %v569_v36, 0.0 }
 0x733   :  { %v570_v61 = vpop.f32.mrf.mxu0 }
 0x734   :  { %v571_v37 = vadd.f32 %v570_v61, %v1530_v60 }
 0x736   :  { %v574_v42 = vmax.f32 %v571_v37, 0.0 }
 0x738   :  { %v575_v43 = vpack.c.bf16 %v574_v42, %v573_v41  ;;  %v648_v42 = vpop.permute.xlu2 %647 }
 0x73a   :  { %1152 = vmatmul.msk.bf16.vlgmr.msra.gmra.mxu3 %vm220_vm6, %v575_v43 }
 0x7bd   :  { %v595_v47 = vpop.f32.mrf.mxu3 }
 0x7be   :  { %v596_v48 = vadd.f32 %v595_v47, %v581_v44 }
 0x7c0   :  { %v600_v49 = vadd.f32 %v596_v48, %v537_v8 }
 0x7c2   :  { %v602_v50 = vsel %vm264_vm3, %v600_v49, 0.0 }
 0x7c3   :  { %603 = vadd.xlane.f32.xlu1 %v602_v50 }
 0x7c5   :  { %v597_v51 = vpop.f32.mrf.mxu3 }
 0x7c6   :  { %v598_v52 = vadd.f32 %v597_v51, %v581_v44 }
 0x7c8   :  { %v601_v57 = vadd.f32 %v598_v52, %v538_v27 }
 0x7ca   :  { %v605_v58 = vsel %vm264_vm3, %v601_v57, 0.0 }
 0x7cb   :  { %606 = vadd.xlane.f32.xlu1 %v605_v58  ;;  %v662_v58 = vperm.slane %v475_v33, 4 }
 0x836   :  { %v604_v62 = vpop.xlane.xlu1 %603 }
 0x837   :  { %v608_v60 = vmul.f32 %v604_v62, %v1534_v39 }
 0x839   :  { %v610_v63 = vsub.f32 %v600_v49, %v608_v60 }
 0x83b   :  { %v612_v0 = vmul.f32 %v610_v63, %v610_v63 }
 0x83d   :  { %v614_v13 = vsel %vm264_vm3, %v612_v0, 0.0 }
 0x83e   :  { %615 = vadd.xlane.f32.xlu1 %v614_v13  ;;  %v607_v2 = vpop.xlane.xlu1 %606 }
 0x83f   :  { %v609_v4 = vmul.f32 %v607_v2, %v1534_v39 }
 0x841   :  { %v611_v5 = vsub.f32 %v601_v57, %v609_v4 }
 0x843   :  { %v613_v7 = vmul.f32 %v611_v5, %v611_v5 }
 0x845   :  { %v617_v3 = vsel %vm264_vm3, %v613_v7, 0.0 }
 0x846   :  { %618 = vadd.xlane.f32.xlu0 %v617_v3 }
 0x857   :  { %652 = vrot.lane.b32.xlu1 %v1547_v55, %s1360_s26 }
 0x8b1   :  { %v616_v11 = vpop.xlane.xlu1 %615 }
 0x8b2   :  { %v620_v12 = vmul.f32 %v616_v11, %v1534_v39 }
 0x8b4   :  { %v622_v10 = vadd.f32 1e-05, %v620_v12 }
 0x8b6   :  { %1257 = vrsqrt.f32 %v622_v10  ;;  %vm630_vm15 = vweird.f32 %v622_v10 }
 0x8b9   :  { %v619_v18 = vpop.xlane.xlu0 %618 }
 0x8ba   :  { %v621_v19 = vmul.f32 %v619_v18, %v1534_v39 }
 0x8bc   :  { %v1258_v20 = vpop.eup %1257  ;;  %v623_v21 = vadd.f32 1e-05, %v621_v19 }
 0x8bd   :  { %v625_v22 = vmul.f32 %v1258_v20, %v622_v10  ;;  %vm631_vm14 = vweird.f32 %v1258_v20 }
 0x8be   :  { %1259 = vrsqrt.f32 %v623_v21  ;;  %vm632_vm0 = vmor %vm630_vm15, %vm631_vm14  ;;  %vm640_vm7 = vweird.f32 %v623_v21 }
 0x8bf   :  { %v626_v23 = vmul.f32 %v1258_v20, %v625_v22 }
 0x8c1   :  { %v627_v25 = vmul.f32 0.5, %v626_v23 }
 0x8c3   :  { %v628_v26 = vsub.f32 1.5, %v627_v25 }
 0x8c4   :  { %v1260_v1 = vpop.eup %1259 }
 0x8c5   :  { %v635_v8 = vmul.f32 %v1260_v1, %v623_v21  ;;  %v629_v27 = vmul.f32 %v1258_v20, %v628_v26  ;;  %vm641_vm2 = vweird.f32 %v1260_v1 }
 0x8c6   :  { %vm642_vm8 = vmor %vm640_vm7, %vm641_vm2  ;;  %vm1053_vm2 = vcmask 392192   ;;  %vm1083_vm7 = vcmask 7168  }
 0x8c7   :  { %v636_v28 = vmul.f32 %v1260_v1, %v635_v8  ;;  %v633_v36 = vsel %vm632_vm0, %v1258_v20, %v629_v27 }
 0x8c8   :  { %v644_v37 = vmul.f32 %v633_v36, %v610_v63 }
 0x8c9   :  { %v637_v29 = vmul.f32 0.5, %v636_v28  ;;  %v653_v48 = vpop.permute.xlu1 %652 }
 0x8ca   :  { %v650_v47 = vmul.f32 %v648_v42, %v644_v37 }
 0x8cb   :  { %v638_v61 = vsub.f32 1.5, %v637_v29 }
 0x8cc   :  { %v1575_v50 = vadd.f32 %v653_v48, %v650_v47 }
 0x8cd   :  { %v639_v41 = vmul.f32 %v1260_v1, %v638_v61 }
 0x8cf   :  { %v643_v43 = vsel %vm642_vm8, %v1260_v1, %v639_v41 }
 0x8d0   :  { %v645_v44 = vmul.f32 %v643_v43, %v611_v5 }
 0x8d2   :  { %v651_v49 = vmul.f32 %v648_v42, %v645_v44 }
 0x8d4   :  { %v1577_v51 = vadd.f32 %v653_v48, %v651_v49 }
 0x8d6   :  { %v661_v52 = vpack.c.bf16 %v1577_v51, %v1575_v50 }
 0x8d8   :  { %1161 = vmatmul.msk.bf16.vlgmr.msra.gmra.mxu1 %vm264_vm3, %v661_v52 }
 0x955   :  { %v687_v57 = vpop.f32.mrf.mxu1 }
 0x956   :  { %v688_v60 = vadd.f32 %v687_v57, %v662_v58 }
 0x95d   :  { %v689_v62 = vpop.f32.mrf.mxu1 }
 0x95e   :  { %v690_v63 = vadd.f32 %v689_v62, %v662_v58 }
 0x960   :  { %v692_v0 = vsub.f32 %v688_v60, %v690_v63 }
 0x962   :  { %694 = vrot.lane.b32.xlu2 %v692_v0, %s1362_s0 }
 0x9bc   :  { %v695_v13 = vpop.permute.xlu2 %694 }
 0x9bd   :  { %v697_v2 = vmul.f32 %v695_v13, %v688_v60  ;;  %v698_v4 = vmul.f32 %v695_v13, %v690_v63 }
 0x9bf   :  { %v699_v5 = vpack.c.bf16 %v698_v4, %v697_v2 }
 0x9c1   :  { %1162 = vmatmul.msk.bf16.vlgmr.msra.gmra.mxu2 %vm264_vm3, %v699_v5 }
 0xa44   :  { %v712_v7 = vpop.f32.mrf.mxu2 }
 0xa45   :  { %v717_v3 = vsub.f32 0.0, %v712_v7 }
 0xa47   :  { %v719_v9 = vmul.f32 1.442695, %v717_v3 }
 0xa49   :  { %1261 = vpow2.f32 %v719_v9 }
 0xa4c   :  { %v714_v11 = vpop.f32.mrf.mxu2 }
 0xa4d   :  { %v718_v12 = vsub.f32 0.0, %v714_v11 }
 0xa4f   :  { %v1262_v31 = vpop.eup %1261  ;;  %v721_v33 = vmul.f32 1.442695, %v718_v12 }
 0xa50   :  { %v723_v6 = vadd.f32 1.0, %v1262_v31 }
 0xa51   :  { %1263 = vpow2.f32 %v721_v33 }
 0xa52   :  { %1265 = vrcp.f32 %v723_v6 }
 0xa57   :  { %v1264_v10 = vpop.eup %1263 }
 0xa58   :  { %v1266_v18 = vpop.eup %1265  ;;  %v724_v19 = vadd.f32 1.0, %v1264_v10 }
 0xa59   :  { %738 = vperm.xlu1 %1222, %v1266_v18   ;;  %729 = vperm.xlu2 %1221, %v1266_v18  }
 0xa5a   :  { %1267 = vrcp.f32 %v724_v19 }
 0xa60   :  { %v1268_v20 = vpop.eup %1267 }
 0xa61   :  { %1223 = vset.pattern.permute.xlu1 %v1364_v15  ;;  %750 = vperm.xlu0 %1225, %v1268_v20  }
 0xa62   :  { %734 = vperm.xlu2 %1221, %v1268_v20   ;;  %746 = vperm.xlu1 %1223, %v1266_v18  }
 0xa6a   :  { %1224 = vset.pattern.permute.xlu2 %v1365_v16  ;;  %1227 = vset.pattern.permute.xlu1 %v1367_v34 }
 0xa6b   :  { %742 = vperm.xlu2 %1224, %v1268_v20   ;;  %758 = vperm.xlu1 %1227, %v1268_v20  }
 0xa73   :  { %1226 = vset.pattern.permute.xlu2 %v1367_v34 }
 0xa74   :  { %754 = vperm.xlu2 %1226, %v1266_v18  }
 0xa7c   :  { %767 = vrot.lane.b32.xlu2 %v692_v0, %s1360_s26 }
 0xab3   :  { %v730_v21 = vpop.permute.xlu2 %729 }
 0xabc   :  { %v735_v22 = vpop.permute.xlu2 %734 }
 0xac5   :  { %v743_v23 = vpop.permute.xlu2 %742 }
 0xac6   :  { %v762_v29 = vsel %vm418_vm4, %v735_v22, %v743_v23 }
 0xacb   :  { %v739_v25 = vpop.permute.xlu1 %738 }
 0xacc   :  { %v761_v15 = vsel %vm418_vm4, %v730_v21, %v739_v25 }
 0xace   :  { %v755_v26 = vpop.permute.xlu2 %754 }
 0xad3   :  { %v751_v34 = vpop.permute.xlu0 %750 }
 0xad4   :  { %v747_v1 = vpop.permute.xlu1 %746  ;;  %v764_v36 = vsel %vm421_vm5, %v762_v29, %v751_v34 }
 0xad5   :  { %v763_v8 = vsel %vm421_vm5, %v761_v15, %v747_v1  ;;  %v815_v15 = vld [vmem:[#allocation6 + $0x8c] sm:$0x1] }
 0xad6   :  { %v768_v16 = vpop.permute.xlu2 %767  ;;  %v765_v27 = vsel %vm76_vm1, %v763_v8, %v755_v26 }
 0xad7   :  { %v770_v28 = vmul.f32 %v768_v16, %v765_v27 }
 0xad9   :  { %774 = vrot.lane.b32.xlu1 %v770_v28, %s1360_s26 }
 0xadd   :  { %v759_v61 = vpop.permute.xlu1 %758 }
 0xade   :  { %v766_v37 = vsel %vm76_vm1, %v764_v36, %v759_v61 }
 0xadf   :  { %v771_v41 = vmul.f32 %v768_v16, %v766_v37  ;;  %v816_v16 = vunpack.c.l.bf16 %v815_v15 }
 0xae1   :  { %776 = vrot.lane.b32.xlu2 %v771_v41, %s1360_s26  ;;  %788 = vrot.lane.b32.xlu1 %v1420_v30, %s1363_s2  ;;  %v868_v36 = vperm.slane %v816_v16, 0 }
 0xae9   :  { %786 = vrot.lane.b32.xlu2 %v1423_v32, %s1363_s2 }
 0xaf1   :  { %793 = vrot.lane.b32.xlu2 %v662_v58, %s1363_s2 }
 0xb3b   :  { %v777_v42 = vpop.permute.xlu2 %776 }
 0xb3c   :  { %v781_v44 = vadd.f32 %v777_v42, %v690_v63 }
 0xb43   :  { %v787_v52 = vpop.permute.xlu2 %786 }
 0xb4b   :  { %v775_v43 = vpop.permute.xlu1 %774  ;;  %v794_v30 = vpop.permute.xlu2 %793 }
 0xb4c   :  { %v780_v47 = vadd.f32 %v775_v43, %v690_v63 }
 0xb4e   :  { %v782_v48 = vpack.c.bf16 %v781_v44, %v780_v47 }
 0xb50   :  { %784 = vrot.lane.b32.xlu1 %v782_v48, %s1360_s26 }
 0xb53   :  { %v789_v49 = vpop.permute.xlu1 %788 }
 0xb54   :  { %805 = vmatpush.bf16.msrb.mxu0 %v789_v49 }
 0xb58   :  { %806 = vmatpush.bf16.msrb.mxu0 %v787_v52 }
 0xbc2   :  { %v785_v57 = vpop.permute.xlu1 %784 }
 0xbc3   :  { %1163 = vmatmul.msk.bf16.vlgmr.msrb.gmra.mxu0 %vm264_vm3, %v785_v57 }
 0xc40   :  { %v808_v62 = vpop.f32.mrf.mxu0 }
 0xc41   :  { %v809_v60 = vadd.f32 %v808_v62, %v794_v30 }
 0xc43   :  { %v813_v32 = vadd.f32 %v809_v60, %v1575_v50 }
 0xc45   :  { %v817_v58 = vsel %vm264_vm3, %v813_v32, 0.0 }
 0xc46   :  { %818 = vadd.xlane.f32.xlu1 %v817_v58 }
 0xc48   :  { %v810_v0 = vpop.f32.mrf.mxu0 }
 0xc49   :  { %v811_v63 = vadd.f32 %v810_v0, %v794_v30 }
 0xc4b   :  { %v814_v13 = vadd.f32 %v811_v63, %v1577_v51 }
 0xc4d   :  { %v820_v2 = vsel %vm264_vm3, %v814_v13, 0.0 }
 0xc4e   :  { %821 = vadd.xlane.f32.xlu0 %v820_v2 }
 0xc62   :  { %874 = vrot.lane.b32.xlu0 %v1551_v56, %s1360_s26 }
 0xc6a   :  { %904 = vrot.lane.b32.xlu0 %v1481_v40, %s1362_s0  ;;  %v861_v40 = vperm.slane %v477_v54, 6 }
 0xc72   :  { %900 = vrot.lane.b32.xlu0 %v1486_v45, %s1362_s0 }
 0xcb9   :  { %v819_v50 = vpop.xlane.xlu1 %818 }
 0xcba   :  { %v823_v4 = vmul.f32 %v819_v50, %v1534_v39 }
 0xcbc   :  { %v825_v5 = vsub.f32 %v813_v32, %v823_v4 }
 0xcbe   :  { %v827_v7 = vmul.f32 %v825_v5, %v825_v5 }
 0xcc0   :  { %v829_v3 = vsel %vm264_vm3, %v827_v7, 0.0 }
 0xcc1   :  { %v822_v51 = vpop.xlane.xlu0 %821  ;;  %830 = vadd.xlane.f32.xlu2 %v829_v3 }
 0xcc2   :  { %v824_v9 = vmul.f32 %v822_v51, %v1534_v39 }
 0xcc4   :  { %v826_v11 = vsub.f32 %v814_v13, %v824_v9 }
 0xcc6   :  { %v828_v12 = vmul.f32 %v826_v11, %v826_v11 }
 0xcc8   :  { %v832_v56 = vsel %vm264_vm3, %v828_v12, 0.0 }
 0xcc9   :  { %833 = vadd.xlane.f32.xlu1 %v832_v56 }
 0xcd4   :  { %v875_v31 = vpop.permute.xlu0 %874 }
 0xcd5   :  { %887 = vmatpush.bf16.msrb.mxu3 %v875_v31 }
 0xcd9   :  { %863 = vrot.lane.b32.xlu2 %v861_v40, %s1363_s2 }
 0xcdc   :  { %v905_v10 = vpop.permute.xlu0 %904 }
 0xcdd   :  { %920 = vmatpush.bf16.msrb.mxu1 %v905_v10 }
 0xce1   :  { %902 = vrot.lane.b32.xlu2 %v1473_v35, %s1362_s0 }
 0xce2   :  { %872 = vrot.lane.b32.xlu1 %v1555_v59, %s1360_s26 }
 0xce4   :  { %v901_v49 = vpop.permute.xlu0 %900 }
 0xce9   :  { %910 = vrot.lane.b32.xlu2 %v861_v40, %s1360_s26 }
 0xcea   :  { %898 = vrot.lane.b32.xlu1 %v1477_v38, %s1362_s0 }
 0xd34   :  { %v831_v45 = vpop.xlane.xlu2 %830 }
 0xd35   :  { %v835_v33 = vmul.f32 %v831_v45, %v1534_v39 }
 0xd37   :  { %v837_v53 = vadd.f32 1e-05, %v835_v33 }
 0xd39   :  { %1269 = vrsqrt.f32 %v837_v53  ;;  %vm845_vm4 = vweird.f32 %v837_v53 }
 0xd3c   :  { %v834_v54 = vpop.xlane.xlu1 %833  ;;  %v864_v28 = vpop.permute.xlu2 %863 }
 0xd3d   :  { %v836_v6 = vmul.f32 %v834_v54, %v1534_v39 }
 0xd3f   :  { %v1270_v35 = vpop.eup %1269  ;;  %v838_v18 = vadd.f32 1e-05, %v836_v6  ;;  %v1228_v6 = vpack.i.bf16 %v1432_v46, %v868_v36 }
 0xd40   :  { %v840_v59 = vmul.f32 %v1270_v35, %v837_v53  ;;  %vm846_vm1 = vweird.f32 %v1270_v35 }
 0xd41   :  { %1271 = vrsqrt.f32 %v838_v18  ;;  %vm847_vm5 = vmor %vm845_vm4, %vm846_vm1  ;;  %vm855_vm10 = vweird.f32 %v838_v18 }
 0xd42   :  { %v841_v19 = vmul.f32 %v1270_v35, %v840_v59 }
 0xd44   :  { %v842_v20 = vmul.f32 0.5, %v841_v19  ;;  %v903_v48 = vpop.permute.xlu2 %902 }
 0xd45   :  { %921 = vmatpush.bf16.msrb.mxu1 %v903_v48 }
 0xd46   :  { %v843_v21 = vsub.f32 1.5, %v842_v20 }
 0xd47   :  { %v1272_v38 = vpop.eup %1271 }
 0xd48   :  { %v850_v22 = vmul.f32 %v1272_v38, %v838_v18  ;;  %v844_v23 = vmul.f32 %v1270_v35, %v843_v21  ;;  %vm856_vm9 = vweird.f32 %v1272_v38 }
 0xd49   :  { %vm857_vm11 = vmor %vm855_vm10, %vm856_vm9  ;;  %922 = vmatpush.bf16.msrb.mxu1 %v901_v49 }
 0xd4a   :  { %v851_v25 = vmul.f32 %v1272_v38, %v850_v22  ;;  %v848_v1 = vsel %vm847_vm5, %v1270_v35, %v844_v23 }
 0xd4b   :  { %v859_v27 = vmul.f32 %v848_v1, %v825_v5 }
 0xd4c   :  { %v852_v26 = vmul.f32 0.5, %v851_v25  ;;  %v911_v63 = vpop.permute.xlu2 %910 }
 0xd4d   :  { %v866_v37 = vmul.f32 %v864_v28, %v859_v27 }
 0xd4e   :  { %v853_v8 = vsub.f32 1.5, %v852_v26 }
 0xd4f   :  { %v869_v43 = vadd.f32 %v868_v36, %v866_v37 }
 0xd50   :  { %v854_v34 = vmul.f32 %v1272_v38, %v853_v8 }
 0xd52   :  { %v858_v29 = vsel %vm857_vm11, %v1272_v38, %v854_v34 }
 0xd53   :  { %v860_v61 = vmul.f32 %v858_v29, %v826_v11 }
 0xd54   :  { %v873_v41 = vpop.permute.xlu1 %872 }
 0xd55   :  { %v867_v42 = vmul.f32 %v864_v28, %v860_v61  ;;  %888 = vmatpush.bf16.msrb.mxu3 %v873_v41 }
 0xd57   :  { %v870_v44 = vadd.f32 %v868_v36, %v867_v42 }
 0xd59   :  { %v871_v47 = vpack.c.bf16 %v870_v44, %v869_v43 }
 0xd5b   :  { %1164 = vmatmul.msk.bf16.vlgmr.msrb.gmra.mxu3 %vm264_vm3, %v871_v47 }
 0xd5c   :  { %v899_v52 = vpop.permute.xlu1 %898 }
 0xd5d   :  { %923 = vmatpush.bf16.msrb.mxu1 %v899_v52 }
 0xdde   :  { %v890_v57 = vpop.f32.mrf.mxu3 }
 0xddf   :  { %v891_v30 = vadd.f32 %v890_v57, %v861_v40 }
 0xde1   :  { %v895_v32 = vmax.f32 %v891_v30, 0.0 }
 0xde6   :  { %v892_v62 = vpop.f32.mrf.mxu3 }
 0xde7   :  { %v893_v60 = vadd.f32 %v892_v62, %v861_v40  ;;  %v1196_v62 = vld [vmem:[#allocation6 + $0x78] sm:$0xff] }
 0xde9   :  { %v896_v58 = vmax.f32 %v893_v60, 0.0  ;;  %v1195_v60 = vld [vmem:[#allocation6 + $0x70] sm:$0xff] }
 0xdeb   :  { %v897_v0 = vpack.c.bf16 %v896_v58, %v895_v32  ;;  %v1194_v32 = vld [vmem:[#allocation6 + $0x68] sm:$0xff]  ;;  %v1371_v58 = vmov 112  }
 0xdec   :  { %1233 = vset.pattern.permute.xlu2 %v1371_v58  ;;  %1234 = vset.pattern.permute.xlu0 %v1371_v58 }
 0xded   :  { %1165 = vmatmul.msk.bf16.vlgmr.msrb.gmra.mxu1 %vm220_vm6, %v897_v0 }
 0xe6a   :  { %v925_v13 = vpop.f32.mrf.mxu1 }
 0xe6b   :  { %v926_v2 = vadd.f32 %v925_v13, %v911_v63 }
 0xe6d   :  { %v930_v50 = vadd.f32 %v926_v2, %v869_v43 }
 0xe6f   :  { %v932_v4 = vsel %vm264_vm3, %v930_v50, 0.0 }
 0xe70   :  { %933 = vadd.xlane.f32.xlu0 %v932_v4 }
 0xe72   :  { %v927_v5 = vpop.f32.mrf.mxu1 }
 0xe73   :  { %v928_v7 = vadd.f32 %v927_v5, %v911_v63 }
 0xe75   :  { %v931_v3 = vadd.f32 %v928_v7, %v870_v44 }
 0xe77   :  { %v935_v51 = vsel %vm264_vm3, %v931_v3, 0.0 }
 0xe78   :  { %936 = vadd.xlane.f32.xlu1 %v935_v51  ;;  %v237_v51 = vmul.f32 %v1417_v24, %v1417_v24 }
 0xe91   :  { %977 = vrot.lane.b32.xlu1 %v868_v36, %s1362_s0 }
 0xe99   :  { %1045 = vrot.lane.b32.xlu1 %v1196_v62, %s1370_s29 }
 0xea1   :  { %1043 = vrot.lane.b32.xlu1 %v1195_v60, %s1370_s29 }
 0xea9   :  { %1041 = vrot.lane.b32.xlu1 %v1194_v32, %s1370_s29 }
 0xee3   :  { %v934_v9 = vpop.xlane.xlu0 %933 }
 0xee4   :  { %v938_v11 = vmul.f32 %v934_v9, %v1534_v39 }
 0xee6   :  { %v940_v12 = vsub.f32 %v930_v50, %v938_v11 }
 0xee8   :  { %v942_v56 = vmul.f32 %v940_v12, %v940_v12 }
 0xeea   :  { %v944_v40 = vsel %vm264_vm3, %v942_v56, 0.0 }
 0xeeb   :  { %v937_v45 = vpop.xlane.xlu1 %936  ;;  %945 = vadd.xlane.f32.xlu2 %v944_v40 }
 0xeec   :  { %v939_v31 = vmul.f32 %v937_v45, %v1534_v39 }
 0xeee   :  { %v941_v33 = vsub.f32 %v931_v3, %v939_v31 }
 0xef0   :  { %v943_v53 = vmul.f32 %v941_v33, %v941_v33 }
 0xef2   :  { %v947_v54 = vsel %vm264_vm3, %v943_v53, 0.0 }
 0xef3   :  { %948 = vadd.xlane.f32.xlu0 %v947_v54 }
 0xf03   :  { %1229 = vrot.lane.b32.xlu2 %v1228_v6, %s1360_s26  ;;  %v978_v27 = vpop.permute.xlu1 %977 }
 0xf5e   :  { %v946_v10 = vpop.xlane.xlu2 %945 }
 0xf5f   :  { %v950_v35 = vmul.f32 %v946_v10, %v1534_v39 }
 0xf61   :  { %v952_v18 = vadd.f32 1e-05, %v950_v35 }
 0xf63   :  { %1273 = vrsqrt.f32 %v952_v18  ;;  %vm960_vm12 = vweird.f32 %v952_v18 }
 0xf66   :  { %v949_v59 = vpop.xlane.xlu0 %948  ;;  %v1230_v8 = vpop.permute.xlu2 %1229 }
 0xf67   :  { %v951_v19 = vmul.f32 %v949_v59, %v1534_v39  ;;  %v1231_v29 = vunpack.i.l.bf16 %v1230_v8  ;;  %v1232_v37 = vunpack.i.h.bf16 %v1230_v8 }
 0xf69   :  { %v1274_v20 = vpop.eup %1273  ;;  %v953_v21 = vadd.f32 1e-05, %v951_v19 }
 0xf6a   :  { %v955_v38 = vmul.f32 %v1274_v20, %v952_v18  ;;  %vm961_vm6 = vweird.f32 %v1274_v20 }
 0xf6b   :  { %1275 = vrsqrt.f32 %v953_v21  ;;  %vm962_vm13 = vmor %vm960_vm12, %vm961_vm6  ;;  %vm970_vm15 = vweird.f32 %v953_v21 }
 0xf6c   :  { %v956_v22 = vmul.f32 %v1274_v20, %v955_v38 }
 0xf6e   :  { %v957_v23 = vmul.f32 0.5, %v956_v22 }
 0xf70   :  { %v958_v25 = vsub.f32 1.5, %v957_v23 }
 0xf71   :  { %v1276_v26 = vpop.eup %1275 }
 0xf72   :  { %v965_v15 = vmul.f32 %v1276_v26, %v953_v21  ;;  %v959_v1 = vmul.f32 %v1274_v20, %v958_v25  ;;  %vm971_vm14 = vweird.f32 %v1276_v26 }
 0xf73   :  { %vm972_vm0 = vmor %vm970_vm15, %vm971_vm14 }
 0xf74   :  { %v966_v16 = vmul.f32 %v1276_v26, %v965_v15  ;;  %v963_v28 = vsel %vm962_vm13, %v1274_v20, %v959_v1 }
 0xf75   :  { %v974_v34 = vmul.f32 %v963_v28, %v940_v12  ;;  %v1046_v12 = vpop.permute.xlu1 %1045 }
 0xf76   :  { %v967_v39 = vmul.f32 0.5, %v966_v16  ;;  %1062 = vmatpush.bf16.msrb.mxu2 %v1046_v12 }
 0xf77   :  { %v980_v36 = vmul.f32 %v978_v27, %v974_v34 }
 0xf78   :  { %v968_v61 = vsub.f32 1.5, %v967_v39 }
 0xf79   :  { %v985_v41 = vadd.f32 %v1231_v29, %v980_v36 }
 0xf7a   :  { %v969_v42 = vmul.f32 %v1276_v26, %v968_v61 }
 0xf7b   :  { %v990_v43 = vmul.f32 %v1232_v37, %v985_v41 }
 0xf7c   :  { %v973_v44 = vsel %vm972_vm0, %v1276_v26, %v969_v42 }
 0xf7d   :  { %v975_v47 = vmul.f32 %v973_v44, %v941_v33  ;;  %v992_v48 = vsel %vm264_vm3, %v990_v43, 0.0  ;;  %v1044_v56 = vpop.permute.xlu1 %1043 }
 0xf7e   :  { %993 = vadd.xlane.f32.xlu0 %v992_v48  ;;  %1063 = vmatpush.bf16.msrb.mxu2 %v1044_v56 }
 0xf7f   :  { %v981_v49 = vmul.f32 %v978_v27, %v975_v47 }
 0xf81   :  { %v986_v52 = vadd.f32 %v1231_v29, %v981_v49 }
 0xf83   :  { %v991_v57 = vmul.f32 %v1232_v37, %v986_v52  ;;  %v1006_v31 = vsub.f32 %v985_v41, %v986_v52 }
 0xf85   :  { %v995_v30 = vsel %vm264_vm3, %v991_v57, 0.0  ;;  %v1042_v40 = vpop.permute.xlu1 %1041 }
 0xf86   :  { %996 = vadd.xlane.f32.xlu0 %v995_v30  ;;  %1064 = vmatpush.bf16.msrb.mxu2 %v1042_v40 }
 0xf9a   :  { %239 = vrot.lane.b32.xlu0 %v1519_v14, %s1362_s0 }
 0xfa2   :  { %1071 = vrot.lane.b32.xlu0 %v1432_v46, %s1363_s2 }
 0xff1   :  { %v994_v0 = vpop.xlane.xlu0 %993 }
 0xff2   :  { %v998_v13 = vadd.f32 %v994_v0, %v1413_v17 }
 0xff9   :  { %v997_v63 = vpop.xlane.xlu0 %996 }
 0xffa   :  { %v999_v2 = vadd.f32 %v997_v63, %v1413_v17 }
 0xffc   :  { %v1000_v14 = vsub.f32 %v998_v13, %v999_v2 }
 0xffe   :  { %v1001_v50 = vsub.f32 0.0, %v1000_v14 }
0x1000   :  { %v1002_v4 = vmul.f32 1.442695, %v1001_v50 }
0x1002   :  { %1277 = vpow2.f32 %v1002_v4 }
0x1008   :  { %v1278_v46 = vpop.eup %1277 }
0x1009   :  { %v1004_v5 = vadd.f32 1.0, %v1278_v46 }
0x100b   :  { %1279 = vrcp.f32 %v1004_v5 }
0x100c   :  { %v240_v3 = vpop.permute.xlu0 %239 }
0x100d   :  { %v242_v9 = vsub.f32 %v237_v51, %v240_v3 }
0x100f   :  { %v243_v11 = vmul.f32 0.5, %v242_v9 }
0x1011   :  { %v1280_v7 = vpop.eup %1279 }
0x1012   :  { %1009 = vperm.xlu2 %1233, %v1280_v7  }
0x101a   :  { %1015 = vrot.lane.b32.xlu2 %v243_v11, %s1360_s26 }
0x1022   :  { %1050 = vrot.lane.b32.xlu2 %v1547_v55, %s1363_s2  ;;  %v1072_v55 = vpop.permute.xlu0 %1071 }
0x106c   :  { %v1010_v45 = vpop.permute.xlu2 %1009 }
0x106d   :  { %v1012_v33 = vmul.f32 %v1010_v45, %v1006_v31 }
0x106f   :  { %v1013_v53 = vadd.f32 %v1012_v33, %v986_v52 }
0x1074   :  { %v1016_v54 = vpop.permute.xlu2 %1015 }
0x1075   :  { %v1018_v24 = vsel %vm264_vm3, %v1013_v53, %v1016_v54 }
0x1076   :  { %v1025_v6 = vpack.c.bf16 %v1018_v24, %v1018_v24 }
0x1078   :  { %1178 = vmatmul.msk.bf16.vlgmr.msrb.gmra.mxu2 %vm1053_vm2, %v1025_v6 }
0x107c   :  { %v1051_v10 = vpop.permute.xlu2 %1050 }
0x10fb   :  { %v1066_v35 = vpop.f32.mrf.mxu2 }
0x10fc   :  { %v1067_v18 = vadd.f32 %v1066_v35, %v1051_v10 }
0x10fe   :  { %v1070_v59 = vmax.f32 %v1067_v18, 0.0 }
0x1100   :  { %v1074_v19 = vmul.f32 %v1072_v55, %v1070_v59 }
0x1102   :  { %v1075_v20 = vsel %vm264_vm3, %v1074_v19, 0.0 }
0x1103   :  { %v1068_v21 = vpop.f32.mrf.mxu2  ;;  %1076 = vadd.xlane.f32.xlu1 %v1075_v20 }
0x1176   :  { %v1077_v38 = vpop.xlane.xlu1 %1076 }
0x1177   :  { %v1078_v22 = vadd.f32 %v1077_v38, %v1413_v17 }
0x1179   :  { %1080 = vrot.lane.b32.xlu2 %v1078_v22, %s1372_s30 }
0x11d3   :  { %v1081_v23 = vpop.permute.xlu2 %1080 }
0x11d4   :  { %1084 = vst.msk [vmem:[%s1667_s3] sm:$0xff] %vm1083_vm7, %v1081_v23 }
0x11d5   :  { %1089 = vsyncpa [#allocation3], 1 }
0x11d6   :  { %1090 = vsyncpa [#allocation5], 1 }

</bundles_post_ra>
